<compile_context>
chip_gen: v5e
topology: v5e:2x2
jax: 0.10.0
libtpu: 0.0.40
codegen_flags: <defaults>
</compile_context>

<pallas_src>
import functools
import math

import jax
import jax.numpy as jnp
from jax import lax
from jax.experimental import pallas as pl
from jax.experimental.pallas import tpu as pltpu

_MIN_STEP_BYTES = 2 * 1024 * 1024        # target per-grid-step working set
_FALLBACK_VMEM = 64 * 1024 * 1024        # v7x per-TensorCore VMEM (most conservative)


# --------------------------- generation-aware budgets ---------------------------

@functools.lru_cache(maxsize=None)
def _vmem_budget():
    """(vmem_limit_bytes, tile_working_set_budget_bytes) for this TPU generation."""
    phys = _FALLBACK_VMEM
    try:
        info = pltpu.get_tpu_info()
        for attr in ("vmem_capacity_bytes", "vmem_bytes", "vmem_size_bytes"):
            val = getattr(info, attr, None)
            if val:
                phys = int(val)
                break
    except Exception:
        pass
    limit = max(min(int(phys * 0.80), phys - 8 * 1024 * 1024), 32 * 1024 * 1024)
    budget = max(int(phys * 0.45), 16 * 1024 * 1024)
    return limit, budget


# ------------------------------- tile selection ---------------------------------

def _pick_row_tile(h, bytes_per_row, budget):
    """Largest multiple-of-8 divisor of `h` whose working set fits `budget`.
    If the whole image fits in one block, still prefer >=2 row tiles when each
    step stays above _MIN_STEP_BYTES (gives the row-tile axis to megacore)."""
    if h % 8 != 0:
        # TODO(synk): ragged H (not a multiple of 8) streams as a single block per batch.
        return h
    divisors = [d for d in range(8, h + 1, 8) if h % d == 0]
    fitting = [d for d in divisors if d * bytes_per_row <= budget]
    if not fitting:
        return divisors[0]
    best = max(fitting)
    if best == h:
        halves = [d for d in fitting if d < h and d * bytes_per_row >= _MIN_STEP_BYTES]
        if halves:
            best = max(halves)
    return best


def _pick_lane_tile(hw, per_lane_bytes, fixed_bytes, budget):
    """Pick the H*W lane-tile for the feature kernel.  Returns (tile, padded_hw)."""
    avail = max(budget - fixed_bytes, 128 * per_lane_bytes)
    max_lanes = max(128, avail // max(1, per_lane_bytes))
    if hw <= max_lanes:
        return hw, hw                                  # single full-extent block
    cap = (min(hw, max_lanes) // 128) * 128
    t = cap
    while t >= 128:                                    # prefer a divisor (no padding copy)
        if hw % t == 0:
            return t, hw
        t -= 128
    padded = -(-hw // cap) * cap                       # zero-pad: exact for L1 and gram
    return cap, padded


# --------------------------------- kernels ---------------------------------------

def _msr_kernel(pred_ref, gt_ref, mask_ref, loss_ref, *, w_hole, w_valid):
    """Per-(batch, row-tile) partial of
         w_hole*sum((1-m)|pred-gt|) + w_valid*sum(m|pred-gt|)
       computed as sum(|pred-gt| * (w_hole + (w_valid - w_hole)*m)).
    Exact for masks in [0, 1]; the 1-channel mask broadcasts over C in-vreg."""
    p = pred_ref[0].astype(jnp.float32)     # (C, tH, W) -- dense sublane/lane layout
    g = gt_ref[0].astype(jnp.float32)       # (C, tH, W)
    m = mask_ref[0].astype(jnp.float32)     # (1, tH, W), broadcast over C for free
    w = w_hole + (w_valid - w_hole) * m
    partial = jnp.sum(jnp.abs(p - g) * w)
    loss_ref[...] = partial.reshape(1, 1, 1, 1)


def _feat_kernel(fo_ref, fc_ref, fg_ref, prc_ref, style_ref,
                 prc_acc, go_acc, gc_acc, gg_acc, *,
                 inv_n_prc, inv_norm_gram, inv_n_style):
    """Fused perceptual-L1 + gram/style terms for one feature level and one batch
    element, tiled over H*W.  Grams are accumulated un-normalized in f32."""
    t = pl.program_id(1)

    @pl.when(t == 0)
    def _init():
        prc_acc[...] = jnp.zeros_like(prc_acc)
        go_acc[...] = jnp.zeros_like(go_acc)
        gc_acc[...] = jnp.zeros_like(gc_acc)
        gg_acc[...] = jnp.zeros_like(gg_acc)

    fo = fo_ref[0]                          # (C, T), native dtype (no upcast copies)
    fc = fc_ref[0]
    fg = fg_ref[0]

    # perceptual L1 partial sums: cast only the abs-diff to f32
    prc_acc[...] += (jnp.sum(jnp.abs(fo - fg).astype(jnp.float32)) +
                     jnp.sum(jnp.abs(fc - fg).astype(jnp.float32))).reshape(1, 1)

    # unnormalized grams: native-dtype MXU matmuls, f32 accumulation (no concat, no upcast)
    dims = (((1,), (1,)), ((), ()))         # contract the H*W axis of both operands
    go_acc[...] += lax.dot_general(fo, fo, dims, preferred_element_type=jnp.float32)
    gc_acc[...] += lax.dot_general(fc, fc, dims, preferred_element_type=jnp.float32)
    gg_acc[...] += lax.dot_general(fg, fg, dims, preferred_element_type=jnp.float32)

    @pl.when(t == pl.num_programs(1) - 1)
    def _fin():
        g_o = go_acc[...] * inv_norm_gram   # gram = f f^T / (C*H*W), in f32
        g_c = gc_acc[...] * inv_norm_gram
        g_g = gg_acc[...] * inv_norm_gram
        style = (jnp.sum(jnp.abs(g_o - g_g)) +
                 jnp.sum(jnp.abs(g_c - g_g))) * inv_n_style
        prc_ref[...] = (prc_acc[...] * inv_n_prc).reshape(1, 1, 1)
        style_ref[...] = style.reshape(1, 1, 1)


# ------------------------------- call wrappers ------------------------------------

def _interp_nearest(x, scale_factor):
    """F.interpolate(x, scale_factor, mode='nearest', recompute_scale_factor=True)."""
    B, C, H, W = x.shape
    out_h = int(math.floor(H * scale_factor))
    out_w = int(math.floor(W * scale_factor))
    if out_h > 0 and out_w > 0 and H % out_h == 0 and W % out_w == 0:
        return x[:, :, :: H // out_h, :: W // out_w]
    rh = jnp.floor(jnp.arange(out_h) * (H / out_h)).astype(jnp.int32)
    rw = jnp.floor(jnp.arange(out_w) * (W / out_w)).astype(jnp.int32)
    return jnp.take(jnp.take(x, rh, axis=2), rw, axis=3)


def msr_loss(outputs, mask, gt,
             scale_factors=(0.25, 0.5, 1.0),
             weights=((5.0, 0.8), (6.0, 1.0), (10.0, 2.0))):
    vmem_limit, budget = _vmem_budget()
    total = jnp.float32(0.0)
    for output, sf, (w0, w1) in zip(outputs, scale_factors, weights):
        if sf != 1:
            mask_ = _interp_nearest(mask, sf)
            gt_ = _interp_nearest(gt, sf)
        else:
            mask_, gt_ = mask, gt
        B, C, H, W = gt_.shape

        itemsize = max(jnp.dtype(output.dtype).itemsize, jnp.dtype(gt_.dtype).itemsize)
        # double-buffered (pred, gt, mask) rows + in-kernel f32 temporaries
        bytes_per_row = (2 * (2 * C + 1) * itemsize + (C + 1) * 4) * W
        tile_h = _pick_row_tile(H, bytes_per_row, budget)
        n_tiles = H // tile_h

        kern = functools.partial(_msr_kernel, w_hole=float(w0), w_valid=float(w1))
        partials = pl.pallas_call(
            kern,
            out_shape=jax.ShapeDtypeStruct((B, n_tiles, 1, 1), jnp.float32),
            grid_spec=pltpu.PrefetchScalarGridSpec(
                num_scalar_prefetch=0,
                grid=(B, n_tiles),
                in_specs=[pl.BlockSpec((1, C, tile_h, W), lambda b, t: (b, 0, t, 0)),
                          pl.BlockSpec((1, C, tile_h, W), lambda b, t: (b, 0, t, 0)),
                          pl.BlockSpec((1, 1, tile_h, W), lambda b, t: (b, 0, t, 0))],
                out_specs=pl.BlockSpec((1, 1, 1, 1), lambda b, t: (b, t, 0, 0))),
            compiler_params=pltpu.CompilerParams(
                dimension_semantics=("parallel", "parallel"),
                vmem_limit_bytes=vmem_limit),
        )(output, gt_, mask_)
        total = total + jnp.sum(partials) / float(B * C * H * W)
    # TODO(synk): the tiny 0.25x/0.5x levels are per-call-overhead bound; fusing the three
    # levels into one pallas_call (ragged levels) would shave two kernel launches.
    return total


def feature_losses(feat_output_comp, feat_output, feat_gt):
    """Fused perceptual + style losses; one pallas_call per VGG feature level."""
    vmem_limit, budget = _vmem_budget()
    prc_total = jnp.float32(0.0)
    style_total = jnp.float32(0.0)
    for i in range(len(feat_gt)):
        B, C, H, W = feat_gt[i].shape
        HW = H * W
        fo = feat_output[i].reshape(B, C, HW)
        fc = feat_output_comp[i].reshape(B, C, HW)
        fg = feat_gt[i].reshape(B, C, HW)

        itemsize = jnp.dtype(feat_gt[i].dtype).itemsize
        # double-buffered fo/fc/fg blocks + ~2 f32 abs-diff temporaries, per lane
        per_lane = 2 * 3 * C * itemsize + 2 * C * 4
        fixed = 3 * C * C * 4 + 8 * 128 * 4          # gram scratches + accumulator
        tile, hw_padded = _pick_lane_tile(HW, per_lane, fixed, budget)
        if hw_padded != HW:
            pad = ((0, 0), (0, 0), (0, hw_padded - HW))   # zeros are exact for L1 + gram
            fo, fc, fg = jnp.pad(fo, pad), jnp.pad(fc, pad), jnp.pad(fg, pad)
        n_tiles = hw_padded // tile

        kern = functools.partial(_feat_kernel,
                                 inv_n_prc=1.0 / (B * C * HW),
                                 inv_norm_gram=1.0 / (C * HW),
                                 inv_n_style=1.0 / (B * C * C))
        prc_p, style_p = pl.pallas_call(
            kern,
            out_shape=(jax.ShapeDtypeStruct((B, 1, 1), jnp.float32),
                       jax.ShapeDtypeStruct((B, 1, 1), jnp.float32)),
            grid_spec=pltpu.PrefetchScalarGridSpec(
                num_scalar_prefetch=0,
                grid=(B, n_tiles),
                in_specs=[pl.BlockSpec((1, C, tile), lambda b, t: (b, 0, t)),
                          pl.BlockSpec((1, C, tile), lambda b, t: (b, 0, t)),
                          pl.BlockSpec((1, C, tile), lambda b, t: (b, 0, t))],
                out_specs=(pl.BlockSpec((1, 1, 1), lambda b, t: (b, 0, 0)),
                           pl.BlockSpec((1, 1, 1), lambda b, t: (b, 0, 0))),
                scratch_shapes=[pltpu.VMEM((1, 1), jnp.float32),
                                pltpu.VMEM((C, C), jnp.float32),
                                pltpu.VMEM((C, C), jnp.float32),
                                pltpu.VMEM((C, C), jnp.float32)]),
            compiler_params=pltpu.CompilerParams(
                dimension_semantics=("parallel", "arbitrary"),
                vmem_limit_bytes=vmem_limit),
        )(fo, fc, fg)
        prc_total = prc_total + jnp.sum(prc_p)
        style_total = style_total + jnp.sum(style_p)
    return prc_total, style_total


def text_removal_loss(preds, mask_gt, gt):
    # style_loss_force_float32 semantics: grams are accumulated/compared in f32 in-kernel.
    prc, style = feature_losses(preds["feat_output_comp"],
                                preds["feat_output"],
                                preds["feat_gt"])
    return {
        "MSR_loss": msr_loss(preds["output"], mask_gt, gt),
        "prc_loss": prc,
        "style_loss": style,
    }


# ------------------------------------ main ----------------------------------------

if __name__ == "__main__":
    key = jax.random.PRNGKey(0)
    B, C_IMG, H, W = 2, 3, 16, 16

    keys = jax.random.split(key, 16)
    k = iter(keys)

    gt = jax.random.normal(next(k), (B, C_IMG, H, W), dtype=jnp.float32)
    mask_gt = (jax.random.uniform(next(k), (B, 1, H, W)) > 0.5).astype(jnp.float32)

    # multi-scale predicted outputs at 0.25x, 0.5x, 1.0x resolution
    outputs = [
        jax.random.normal(next(k), (B, C_IMG, H // 4, W // 4), dtype=jnp.float32),
        jax.random.normal(next(k), (B, C_IMG, H // 2, W // 2), dtype=jnp.float32),
        jax.random.normal(next(k), (B, C_IMG, H, W), dtype=jnp.float32),
    ]

    # 3 feature pyramid levels (VGG-like), per tensor group
    feat_shapes = [(B, 8, 16, 16), (B, 16, 8, 8), (B, 32, 4, 4)]
    feat_output = [jax.random.normal(next(k), s, dtype=jnp.float32) for s in feat_shapes]
    feat_output_comp = [jax.random.normal(next(k), s, dtype=jnp.float32) for s in feat_shapes]
    feat_gt = [jax.random.normal(next(k), s, dtype=jnp.float32) for s in feat_shapes]

    preds = {
        "output": outputs,
        "feat_output": feat_output,
        "feat_output_comp": feat_output_comp,
        "feat_gt": feat_gt,
    }

    loss_fn = jax.jit(text_removal_loss)
    losses = loss_fn(preds, mask_gt, gt)
    losses = jax.tree_util.tree_map(jax.block_until_ready, losses)

    for name in ("MSR_loss", "prc_loss", "style_loss"):
        print(f"{name}: {float(losses[name]):.6f}")
    print("KERNEL_OK")
</pallas_src>

<mosaic_0001>
module attributes {stable_mosaic.version = 11 : i64} {
  func.func @_msr_kernel(%arg0: i32, %arg1: i32, %arg2: memref<1x3x16x16xf32, #tpu.memory_space<vmem>>, %arg3: memref<1x3x16x16xf32, #tpu.memory_space<vmem>>, %arg4: memref<1x1x16x16xf32, #tpu.memory_space<vmem>>, %arg5: memref<1x1x1x1xf32, #tpu.memory_space<vmem>>) attributes {dimension_semantics = [#tpu.dimension_semantics<parallel>, #tpu.dimension_semantics<parallel>], iteration_bounds = array<i64: 2, 1>, scalar_prefetch = 0 : i64, scratch_operands = 0 : i64, tpu.core_type = #tpu.core_type<tc>, window_params = [{transform_indices = @transform_0, window_bounds = array<i64: 1, 3, 16, 16>}, {transform_indices = @transform_1, window_bounds = array<i64: 1, 3, 16, 16>}, {transform_indices = @transform_2, window_bounds = array<i64: 1, 1, 16, 16>}, {transform_indices = @transform_3, window_bounds = array<i64: 1, 1, 1, 1>}]} {
    %c0 = arith.constant 0 : index
    %c0_0 = arith.constant 0 : index
    %c0_1 = arith.constant 0 : index
    %c0_2 = arith.constant 0 : index
    %0 = vector.load %arg2[%c0, %c0_0, %c0_1, %c0_2] : memref<1x3x16x16xf32, #tpu.memory_space<vmem>>, vector<1x3x16x16xf32>
    %1 = vector.shape_cast %0 : vector<1x3x16x16xf32> to vector<3x16x16xf32>
    %c0_3 = arith.constant 0 : index
    %c0_4 = arith.constant 0 : index
    %c0_5 = arith.constant 0 : index
    %c0_6 = arith.constant 0 : index
    %2 = vector.load %arg3[%c0_3, %c0_4, %c0_5, %c0_6] : memref<1x3x16x16xf32, #tpu.memory_space<vmem>>, vector<1x3x16x16xf32>
    %3 = vector.shape_cast %2 : vector<1x3x16x16xf32> to vector<3x16x16xf32>
    %c0_7 = arith.constant 0 : index
    %c0_8 = arith.constant 0 : index
    %c0_9 = arith.constant 0 : index
    %c0_10 = arith.constant 0 : index
    %4 = vector.load %arg4[%c0_7, %c0_8, %c0_9, %c0_10] : memref<1x1x16x16xf32, #tpu.memory_space<vmem>>, vector<1x1x16x16xf32>
    %5 = vector.shape_cast %4 : vector<1x1x16x16xf32> to vector<1x16x16xf32>
    %cst = arith.constant -8.000000e+00 : f32
    %6 = vector.broadcast %cst : f32 to vector<1x16x16xf32>
    %7 = arith.mulf %6, %5 : vector<1x16x16xf32>
    %cst_11 = arith.constant 1.000000e+01 : f32
    %8 = vector.broadcast %cst_11 : f32 to vector<1x16x16xf32>
    %9 = arith.addf %8, %7 : vector<1x16x16xf32>
    %10 = arith.subf %1, %3 : vector<3x16x16xf32>
    %11 = math.absf %10 : vector<3x16x16xf32>
    %12 = vector.broadcast %9 : vector<1x16x16xf32> to vector<3x16x16xf32>
    %13 = arith.mulf %11, %12 : vector<3x16x16xf32>
    %14 = vector.shape_cast %13 : vector<3x16x16xf32> to vector<1x3x16x16xf32>
    %cst_12 = arith.constant dense<0.000000e+00> : vector<1xf32>
    %15 = vector.multi_reduction <add>, %14, %cst_12 [1, 2, 3] : vector<1x3x16x16xf32> to vector<1xf32>
    %16 = vector.shape_cast %15 : vector<1xf32> to vector<1x1x1x1xf32>
    %17 = vector.extract %16[0, 0, 0, 0] : f32 from vector<1x1x1x1xf32>
    %18 = vector.broadcast %17 : f32 to vector<1x1x1x1xf32>
    %c0_13 = arith.constant 0 : index
    %c0_14 = arith.constant 0 : index
    %c0_15 = arith.constant 0 : index
    %c0_16 = arith.constant 0 : index
    %19 = vector.load %arg5[%c0_13, %c0_14, %c0_15, %c0_16] : memref<1x1x1x1xf32, #tpu.memory_space<vmem>>, vector<1x1x1x1xf32>
    tpu.vector_store %arg5[%c0_13, %c0_14, %c0_15, %c0_16], %18 {strides = array<i32>} : memref<1x1x1x1xf32, #tpu.memory_space<vmem>>, vector<1x1x1x1xf32>,
    return
  }
  func.func @transform_0(%arg0: i32, %arg1: i32) -> (i32, i32, i32, i32) {
    %c0_i32 = arith.constant 0 : i32
    %c0_i32_0 = arith.constant 0 : i32
    %c0_i32_1 = arith.constant 0 : i32
    return %arg0, %c0_i32, %arg1, %c0_i32_0 : i32, i32, i32, i32
  }
  func.func @transform_1(%arg0: i32, %arg1: i32) -> (i32, i32, i32, i32) {
    %c0_i32 = arith.constant 0 : i32
    %c0_i32_0 = arith.constant 0 : i32
    %c0_i32_1 = arith.constant 0 : i32
    return %arg0, %c0_i32, %arg1, %c0_i32_0 : i32, i32, i32, i32
  }
  func.func @transform_2(%arg0: i32, %arg1: i32) -> (i32, i32, i32, i32) {
    %c0_i32 = arith.constant 0 : i32
    %c0_i32_0 = arith.constant 0 : i32
    %c0_i32_1 = arith.constant 0 : i32
    return %arg0, %c0_i32, %arg1, %c0_i32_0 : i32, i32, i32, i32
  }
  func.func @transform_3(%arg0: i32, %arg1: i32) -> (i32, i32, i32, i32) {
    %c0_i32 = arith.constant 0 : i32
    %c0_i32_0 = arith.constant 0 : i32
    %c0_i32_1 = arith.constant 0 : i32
    return %arg0, %arg1, %c0_i32, %c0_i32_0 : i32, i32, i32, i32
  }
}

module attributes {stable_mosaic.version = 11 : i64} {
  func.func @_msr_kernel(%arg0: i32, %arg1: i32, %arg2: memref<1x3x4x4xf32, #tpu.memory_space<vmem>>, %arg3: memref<1x3x4x4xf32, #tpu.memory_space<vmem>>, %arg4: memref<1x1x4x4xf32, #tpu.memory_space<vmem>>, %arg5: memref<1x1x1x1xf32, #tpu.memory_space<vmem>>) attributes {dimension_semantics = [#tpu.dimension_semantics<parallel>, #tpu.dimension_semantics<parallel>], iteration_bounds = array<i64: 2, 1>, scalar_prefetch = 0 : i64, scratch_operands = 0 : i64, tpu.core_type = #tpu.core_type<tc>, window_params = [{transform_indices = @transform_0, window_bounds = array<i64: 1, 3, 4, 4>}, {transform_indices = @transform_1, window_bounds = array<i64: 1, 3, 4, 4>}, {transform_indices = @transform_2, window_bounds = array<i64: 1, 1, 4, 4>}, {transform_indices = @transform_3, window_bounds = array<i64: 1, 1, 1, 1>}]} {
    %c0 = arith.constant 0 : index
    %c0_0 = arith.constant 0 : index
    %c0_1 = arith.constant 0 : index
    %c0_2 = arith.constant 0 : index
    %0 = vector.load %arg2[%c0, %c0_0, %c0_1, %c0_2] : memref<1x3x4x4xf32, #tpu.memory_space<vmem>>, vector<1x3x4x4xf32>
    %1 = vector.shape_cast %0 : vector<1x3x4x4xf32> to vector<3x4x4xf32>
    %c0_3 = arith.constant 0 : index
    %c0_4 = arith.constant 0 : index
    %c0_5 = arith.constant 0 : index
    %c0_6 = arith.constant 0 : index
    %2 = vector.load %arg3[%c0_3, %c0_4, %c0_5, %c0_6] : memref<1x3x4x4xf32, #tpu.memory_space<vmem>>, vector<1x3x4x4xf32>
    %3 = vector.shape_cast %2 : vector<1x3x4x4xf32> to vector<3x4x4xf32>
    %c0_7 = arith.constant 0 : index
    %c0_8 = arith.constant 0 : index
    %c0_9 = arith.constant 0 : index
    %c0_10 = arith.constant 0 : index
    %4 = vector.load %arg4[%c0_7, %c0_8, %c0_9, %c0_10] : memref<1x1x4x4xf32, #tpu.memory_space<vmem>>, vector<1x1x4x4xf32>
    %5 = vector.shape_cast %4 : vector<1x1x4x4xf32> to vector<1x4x4xf32>
    %cst = arith.constant -4.200000e+00 : f32
    %6 = vector.broadcast %cst : f32 to vector<1x4x4xf32>
    %7 = arith.mulf %6, %5 : vector<1x4x4xf32>
    %cst_11 = arith.constant 5.000000e+00 : f32
    %8 = vector.broadcast %cst_11 : f32 to vector<1x4x4xf32>
    %9 = arith.addf %8, %7 : vector<1x4x4xf32>
    %10 = arith.subf %1, %3 : vector<3x4x4xf32>
    %11 = math.absf %10 : vector<3x4x4xf32>
    %12 = vector.broadcast %9 : vector<1x4x4xf32> to vector<3x4x4xf32>
    %13 = arith.mulf %11, %12 : vector<3x4x4xf32>
    %14 = vector.shape_cast %13 : vector<3x4x4xf32> to vector<1x3x4x4xf32>
    %cst_12 = arith.constant dense<0.000000e+00> : vector<1xf32>
    %15 = vector.multi_reduction <add>, %14, %cst_12 [1, 2, 3] : vector<1x3x4x4xf32> to vector<1xf32>
    %16 = vector.shape_cast %15 : vector<1xf32> to vector<1x1x1x1xf32>
    %17 = vector.extract %16[0, 0, 0, 0] : f32 from vector<1x1x1x1xf32>
    %18 = vector.broadcast %17 : f32 to vector<1x1x1x1xf32>
    %c0_13 = arith.constant 0 : index
    %c0_14 = arith.constant 0 : index
    %c0_15 = arith.constant 0 : index
    %c0_16 = arith.constant 0 : index
    %19 = vector.load %arg5[%c0_13, %c0_14, %c0_15, %c0_16] : memref<1x1x1x1xf32, #tpu.memory_space<vmem>>, vector<1x1x1x1xf32>
    tpu.vector_store %arg5[%c0_13, %c0_14, %c0_15, %c0_16], %18 {strides = array<i32>} : memref<1x1x1x1xf32, #tpu.memory_space<vmem>>, vector<1x1x1x1xf32>,
    return
  }
  func.func @transform_0(%arg0: i32, %arg1: i32) -> (i32, i32, i32, i32) {
    %c0_i32 = arith.constant 0 : i32
    %c0_i32_0 = arith.constant 0 : i32
    %c0_i32_1 = arith.constant 0 : i32
    return %arg0, %c0_i32, %arg1, %c0_i32_0 : i32, i32, i32, i32
  }
  func.func @transform_1(%arg0: i32, %arg1: i32) -> (i32, i32, i32, i32) {
    %c0_i32 = arith.constant 0 : i32
    %c0_i32_0 = arith.constant 0 : i32
    %c0_i32_1 = arith.constant 0 : i32
    return %arg0, %c0_i32, %arg1, %c0_i32_0 : i32, i32, i32, i32
  }
  func.func @transform_2(%arg0: i32, %arg1: i32) -> (i32, i32, i32, i32) {
    %c0_i32 = arith.constant 0 : i32
    %c0_i32_0 = arith.constant 0 : i32
    %c0_i32_1 = arith.constant 0 : i32
    return %arg0, %c0_i32, %arg1, %c0_i32_0 : i32, i32, i32, i32
  }
  func.func @transform_3(%arg0: i32, %arg1: i32) -> (i32, i32, i32, i32) {
    %c0_i32 = arith.constant 0 : i32
    %c0_i32_0 = arith.constant 0 : i32
    %c0_i32_1 = arith.constant 0 : i32
    return %arg0, %arg1, %c0_i32, %c0_i32_0 : i32, i32, i32, i32
  }
}

module attributes {stable_mosaic.version = 11 : i64} {
  func.func @_feat_kernel(%arg0: i32, %arg1: i32, %arg2: memref<1x8x256xf32, #tpu.memory_space<vmem>>, %arg3: memref<1x8x256xf32, #tpu.memory_space<vmem>>, %arg4: memref<1x8x256xf32, #tpu.memory_space<vmem>>, %arg5: memref<1x1x1xf32, #tpu.memory_space<vmem>>, %arg6: memref<1x1x1xf32, #tpu.memory_space<vmem>>, %arg7: memref<1x1xf32, #tpu.memory_space<vmem>>, %arg8: memref<8x8xf32, #tpu.memory_space<vmem>>, %arg9: memref<8x8xf32, #tpu.memory_space<vmem>>, %arg10: memref<8x8xf32, #tpu.memory_space<vmem>>) attributes {dimension_semantics = [#tpu.dimension_semantics<parallel>, #tpu.dimension_semantics<arbitrary>], iteration_bounds = array<i64: 2, 1>, scalar_prefetch = 0 : i64, scratch_operands = 4 : i64, tpu.core_type = #tpu.core_type<tc>, window_params = [{transform_indices = @transform_0, window_bounds = array<i64: 1, 8, 256>}, {transform_indices = @transform_1, window_bounds = array<i64: 1, 8, 256>}, {transform_indices = @transform_2, window_bounds = array<i64: 1, 8, 256>}, {transform_indices = @transform_3, window_bounds = array<i64: 1, 1, 1>}, {transform_indices = @transform_4, window_bounds = array<i64: 1, 1, 1>}]} {
    %c0_i32 = arith.constant 0 : i32
    %0 = arith.cmpi eq, %arg1, %c0_i32 : i32
    %1 = arith.extui %0 : i1 to i32
    %c0_i32_0 = arith.constant 0 : i32
    %2 = arith.cmpi ne, %1, %c0_i32_0 : i32
    scf.if %2 {
      %cst_31 = arith.constant 0.000000e+00 : f32
      %41 = vector.broadcast %cst_31 : f32 to vector<1x1xf32>
      %c0_32 = arith.constant 0 : index
      %c0_33 = arith.constant 0 : index
      %42 = vector.load %arg7[%c0_32, %c0_33] : memref<1x1xf32, #tpu.memory_space<vmem>>, vector<1x1xf32>
      tpu.vector_store %arg7[%c0_32, %c0_33], %41 {strides = array<i32>} : memref<1x1xf32, #tpu.memory_space<vmem>>, vector<1x1xf32>,
      %cst_34 = arith.constant 0.000000e+00 : f32
      %43 = vector.broadcast %cst_34 : f32 to vector<8x8xf32>
      %c0_35 = arith.constant 0 : index
      %c0_36 = arith.constant 0 : index
      %44 = vector.load %arg8[%c0_35, %c0_36] : memref<8x8xf32, #tpu.memory_space<vmem>>, vector<8x8xf32>
      tpu.vector_store %arg8[%c0_35, %c0_36], %43 {strides = array<i32>} : memref<8x8xf32, #tpu.memory_space<vmem>>, vector<8x8xf32>,
      %cst_37 = arith.constant 0.000000e+00 : f32
      %45 = vector.broadcast %cst_37 : f32 to vector<8x8xf32>
      %c0_38 = arith.constant 0 : index
      %c0_39 = arith.constant 0 : index
      %46 = vector.load %arg9[%c0_38, %c0_39] : memref<8x8xf32, #tpu.memory_space<vmem>>, vector<8x8xf32>
      tpu.vector_store %arg9[%c0_38, %c0_39], %45 {strides = array<i32>} : memref<8x8xf32, #tpu.memory_space<vmem>>, vector<8x8xf32>,
      %cst_40 = arith.constant 0.000000e+00 : f32
      %47 = vector.broadcast %cst_40 : f32 to vector<8x8xf32>
      %c0_41 = arith.constant 0 : index
      %c0_42 = arith.constant 0 : index
      %48 = vector.load %arg10[%c0_41, %c0_42] : memref<8x8xf32, #tpu.memory_space<vmem>>, vector<8x8xf32>
      tpu.vector_store %arg10[%c0_41, %c0_42], %47 {strides = array<i32>} : memref<8x8xf32, #tpu.memory_space<vmem>>, vector<8x8xf32>,
    } else {
    }
    %c0 = arith.constant 0 : index
    %c0_1 = arith.constant 0 : index
    %c0_2 = arith.constant 0 : index
    %3 = vector.load %arg2[%c0, %c0_1, %c0_2] : memref<1x8x256xf32, #tpu.memory_space<vmem>>, vector<1x8x256xf32>
    %4 = vector.shape_cast %3 : vector<1x8x256xf32> to vector<8x256xf32>
    %c0_3 = arith.constant 0 : index
    %c0_4 = arith.constant 0 : index
    %c0_5 = arith.constant 0 : index
    %5 = vector.load %arg3[%c0_3, %c0_4, %c0_5] : memref<1x8x256xf32, #tpu.memory_space<vmem>>, vector<1x8x256xf32>
    %6 = vector.shape_cast %5 : vector<1x8x256xf32> to vector<8x256xf32>
    %c0_6 = arith.constant 0 : index
    %c0_7 = arith.constant 0 : index
    %c0_8 = arith.constant 0 : index
    %7 = vector.load %arg4[%c0_6, %c0_7, %c0_8] : memref<1x8x256xf32, #tpu.memory_space<vmem>>, vector<1x8x256xf32>
    %8 = vector.shape_cast %7 : vector<1x8x256xf32> to vector<8x256xf32>
    %c0_9 = arith.constant 0 : index
    %c0_10 = arith.constant 0 : index
    %9 = vector.load %arg7[%c0_9, %c0_10] : memref<1x1xf32, #tpu.memory_space<vmem>>, vector<1x1xf32>
    %10 = arith.subf %4, %8 : vector<8x256xf32>
    %11 = math.absf %10 : vector<8x256xf32>
    %12 = vector.shape_cast %11 : vector<8x256xf32> to vector<1x8x256xf32>
    %cst = arith.constant dense<0.000000e+00> : vector<1xf32>
    %13 = vector.multi_reduction <add>, %12, %cst [1, 2] : vector<1x8x256xf32> to vector<1xf32>
    %14 = vector.shape_cast %13 : vector<1xf32> to vector<1x1x1xf32>
    %15 = vector.extract %14[0, 0, 0] : f32 from vector<1x1x1xf32>
    %16 = arith.subf %6, %8 : vector<8x256xf32>
    %17 = math.absf %16 : vector<8x256xf32>
    %18 = vector.shape_cast %17 : vector<8x256xf32> to vector<1x8x256xf32>
    %cst_11 = arith.constant dense<0.000000e+00> : vector<1xf32>
    %19 = vector.multi_reduction <add>, %18, %cst_11 [1, 2] : vector<1x8x256xf32> to vector<1xf32>
    %20 = vector.shape_cast %19 : vector<1xf32> to vector<1x1x1xf32>
    %21 = vector.extract %20[0, 0, 0] : f32 from vector<1x1x1xf32>
    %22 = arith.addf %15, %21 : f32
    %23 = vector.broadcast %22 : f32 to vector<1x1xf32>
    %24 = arith.addf %9, %23 : vector<1x1xf32>
    %c0_12 = arith.constant 0 : index
    %c0_13 = arith.constant 0 : index
    %25 = vector.load %arg7[%c0_12, %c0_13] : memref<1x1xf32, #tpu.memory_space<vmem>>, vector<1x1xf32>
    tpu.vector_store %arg7[%c0_12, %c0_13], %24 {strides = array<i32>} : memref<1x1xf32, #tpu.memory_space<vmem>>, vector<1x1xf32>,
    %c0_14 = arith.constant 0 : index
    %c0_15 = arith.constant 0 : index
    %26 = vector.load %arg8[%c0_14, %c0_15] : memref<8x8xf32, #tpu.memory_space<vmem>>, vector<8x8xf32>
    %cst_16 = arith.constant dense<0.000000e+00> : vector<8x8xf32>
    %27 = tpu.matmul %4, %4, %cst_16 {dimension_numbers = #tpu.dot_dimension_numbers<[1], [1], [0], [0], [0, 0, 1, 0], [], []>} : vector<8x256xf32>, vector<8x256xf32>, vector<8x8xf32> -> vector<8x8xf32>
    %28 = arith.addf %26, %27 : vector<8x8xf32>
    %c0_17 = arith.constant 0 : index
    %c0_18 = arith.constant 0 : index
    %29 = vector.load %arg8[%c0_17, %c0_18] : memref<8x8xf32, #tpu.memory_space<vmem>>, vector<8x8xf32>
    tpu.vector_store %arg8[%c0_17, %c0_18], %28 {strides = array<i32>} : memref<8x8xf32, #tpu.memory_space<vmem>>, vector<8x8xf32>,
    %c0_19 = arith.constant 0 : index
    %c0_20 = arith.constant 0 : index
    %30 = vector.load %arg9[%c0_19, %c0_20] : memref<8x8xf32, #tpu.memory_space<vmem>>, vector<8x8xf32>
    %cst_21 = arith.constant dense<0.000000e+00> : vector<8x8xf32>
    %31 = tpu.matmul %6, %6, %cst_21 {dimension_numbers = #tpu.dot_dimension_numbers<[1], [1], [0], [0], [0, 0, 1, 0], [], []>} : vector<8x256xf32>, vector<8x256xf32>, vector<8x8xf32> -> vector<8x8xf32>
    %32 = arith.addf %30, %31 : vector<8x8xf32>
    %c0_22 = arith.constant 0 : index
    %c0_23 = arith.constant 0 : index
    %33 = vector.load %arg9[%c0_22, %c0_23] : memref<8x8xf32, #tpu.memory_space<vmem>>, vector<8x8xf32>
    tpu.vector_store %arg9[%c0_22, %c0_23], %32 {strides = array<i32>} : memref<8x8xf32, #tpu.memory_space<vmem>>, vector<8x8xf32>,
    %c0_24 = arith.constant 0 : index
    %c0_25 = arith.constant 0 : index
    %34 = vector.load %arg10[%c0_24, %c0_25] : memref<8x8xf32, #tpu.memory_space<vmem>>, vector<8x8xf32>
    %cst_26 = arith.constant dense<0.000000e+00> : vector<8x8xf32>
    %35 = tpu.matmul %8, %8, %cst_26 {dimension_numbers = #tpu.dot_dimension_numbers<[1], [1], [0], [0], [0, 0, 1, 0], [], []>} : vector<8x256xf32>, vector<8x256xf32>, vector<8x8xf32> -> vector<8x8xf32>
    %36 = arith.addf %34, %35 : vector<8x8xf32>
    %c0_27 = arith.constant 0 : index
    %c0_28 = arith.constant 0 : index
    %37 = vector.load %arg10[%c0_27, %c0_28] : memref<8x8xf32, #tpu.memory_space<vmem>>, vector<8x8xf32>
    tpu.vector_store %arg10[%c0_27, %c0_28], %36 {strides = array<i32>} : memref<8x8xf32, #tpu.memory_space<vmem>>, vector<8x8xf32>,
    %c0_i32_29 = arith.constant 0 : i32
    %38 = arith.cmpi eq, %arg1, %c0_i32_29 : i32
    %39 = arith.extui %38 : i1 to i32
    %c0_i32_30 = arith.constant 0 : i32
    %40 = arith.cmpi ne, %39, %c0_i32_30 : i32
    scf.if %40 {
      %c0_31 = arith.constant 0 : index
      %c0_32 = arith.constant 0 : index
      %41 = vector.load %arg8[%c0_31, %c0_32] : memref<8x8xf32, #tpu.memory_space<vmem>>, vector<8x8xf32>
      %cst_33 = arith.constant 4.8828125E-4 : f32
      %42 = vector.broadcast %cst_33 : f32 to vector<8x8xf32>
      %43 = arith.mulf %41, %42 : vector<8x8xf32>
      %c0_34 = arith.constant 0 : index
      %c0_35 = arith.constant 0 : index
      %44 = vector.load %arg9[%c0_34, %c0_35] : memref<8x8xf32, #tpu.memory_space<vmem>>, vector<8x8xf32>
      %cst_36 = arith.constant 4.8828125E-4 : f32
      %45 = vector.broadcast %cst_36 : f32 to vector<8x8xf32>
      %46 = arith.mulf %44, %45 : vector<8x8xf32>
      %c0_37 = arith.constant 0 : index
      %c0_38 = arith.constant 0 : index
      %47 = vector.load %arg10[%c0_37, %c0_38] : memref<8x8xf32, #tpu.memory_space<vmem>>, vector<8x8xf32>
      %cst_39 = arith.constant 4.8828125E-4 : f32
      %48 = vector.broadcast %cst_39 : f32 to vector<8x8xf32>
      %49 = arith.mulf %47, %48 : vector<8x8xf32>
      %50 = arith.subf %43, %49 : vector<8x8xf32>
      %51 = math.absf %50 : vector<8x8xf32>
      %52 = vector.shape_cast %51 : vector<8x8xf32> to vector<1x8x8xf32>
      %cst_40 = arith.constant dense<0.000000e+00> : vector<1xf32>
      %53 = vector.multi_reduction <add>, %52, %cst_40 [1, 2] : vector<1x8x8xf32> to vector<1xf32>
      %54 = vector.shape_cast %53 : vector<1xf32> to vector<1x1x1xf32>
      %55 = vector.extract %54[0, 0, 0] : f32 from vector<1x1x1xf32>
      %56 = arith.subf %46, %49 : vector<8x8xf32>
      %57 = math.absf %56 : vector<8x8xf32>
      %58 = vector.shape_cast %57 : vector<8x8xf32> to vector<1x8x8xf32>
      %cst_41 = arith.constant dense<0.000000e+00> : vector<1xf32>
      %59 = vector.multi_reduction <add>, %58, %cst_41 [1, 2] : vector<1x8x8xf32> to vector<1xf32>
      %60 = vector.shape_cast %59 : vector<1xf32> to vector<1x1x1xf32>
      %61 = vector.extract %60[0, 0, 0] : f32 from vector<1x1x1xf32>
      %62 = arith.addf %55, %61 : f32
      %cst_42 = arith.constant 7.812500e-03 : f32
      %63 = arith.mulf %62, %cst_42 : f32
      %c0_43 = arith.constant 0 : index
      %c0_44 = arith.constant 0 : index
      %64 = vector.load %arg7[%c0_43, %c0_44] : memref<1x1xf32, #tpu.memory_space<vmem>>, vector<1x1xf32>
      %cst_45 = arith.constant 2.44140625E-4 : f32
      %65 = vector.broadcast %cst_45 : f32 to vector<1x1xf32>
      %66 = arith.mulf %64, %65 : vector<1x1xf32>
      %67 = vector.shape_cast %66 : vector<1x1xf32> to vector<1x1x1xf32>
      %c0_46 = arith.constant 0 : index
      %c0_47 = arith.constant 0 : index
      %c0_48 = arith.constant 0 : index
      %68 = vector.load %arg5[%c0_46, %c0_47, %c0_48] : memref<1x1x1xf32, #tpu.memory_space<vmem>>, vector<1x1x1xf32>
      tpu.vector_store %arg5[%c0_46, %c0_47, %c0_48], %67 {strides = array<i32>} : memref<1x1x1xf32, #tpu.memory_space<vmem>>, vector<1x1x1xf32>,
      %69 = vector.broadcast %63 : f32 to vector<1x1x1xf32>
      %c0_49 = arith.constant 0 : index
      %c0_50 = arith.constant 0 : index
      %c0_51 = arith.constant 0 : index
      %70 = vector.load %arg6[%c0_49, %c0_50, %c0_51] : memref<1x1x1xf32, #tpu.memory_space<vmem>>, vector<1x1x1xf32>
      tpu.vector_store %arg6[%c0_49, %c0_50, %c0_51], %69 {strides = array<i32>} : memref<1x1x1xf32, #tpu.memory_space<vmem>>, vector<1x1x1xf32>,
    } else {
    }
    return
  }
  func.func @transform_0(%arg0: i32, %arg1: i32) -> (i32, i32, i32) {
    %c0_i32 = arith.constant 0 : i32
    %c0_i32_0 = arith.constant 0 : i32
    return %arg0, %c0_i32, %arg1 : i32, i32, i32
  }
  func.func @transform_1(%arg0: i32, %arg1: i32) -> (i32, i32, i32) {
    %c0_i32 = arith.constant 0 : i32
    %c0_i32_0 = arith.constant 0 : i32
    return %arg0, %c0_i32, %arg1 : i32, i32, i32
  }
  func.func @transform_2(%arg0: i32, %arg1: i32) -> (i32, i32, i32) {
    %c0_i32 = arith.constant 0 : i32
    %c0_i32_0 = arith.constant 0 : i32
    return %arg0, %c0_i32, %arg1 : i32, i32, i32
  }
  func.func @transform_3(%arg0: i32, %arg1: i32) -> (i32, i32, i32) {
    %c0_i32 = arith.constant 0 : i32
    %c0_i32_0 = arith.constant 0 : i32
    %c0_i32_1 = arith.constant 0 : i32
    return %arg0, %c0_i32, %c0_i32_0 : i32, i32, i32
  }
  func.func @transform_4(%arg0: i32, %arg1: i32) -> (i32, i32, i32) {
    %c0_i32 = arith.constant 0 : i32
    %c0_i32_0 = arith.constant 0 : i32
    %c0_i32_1 = arith.constant 0 : i32
    return %arg0, %c0_i32, %c0_i32_0 : i32, i32, i32
  }
}

module attributes {stable_mosaic.version = 11 : i64} {
  func.func @_msr_kernel(%arg0: i32, %arg1: i32, %arg2: memref<1x3x8x8xf32, #tpu.memory_space<vmem>>, %arg3: memref<1x3x8x8xf32, #tpu.memory_space<vmem>>, %arg4: memref<1x1x8x8xf32, #tpu.memory_space<vmem>>, %arg5: memref<1x1x1x1xf32, #tpu.memory_space<vmem>>) attributes {dimension_semantics = [#tpu.dimension_semantics<parallel>, #tpu.dimension_semantics<parallel>], iteration_bounds = array<i64: 2, 1>, scalar_prefetch = 0 : i64, scratch_operands = 0 : i64, tpu.core_type = #tpu.core_type<tc>, window_params = [{transform_indices = @transform_0, window_bounds = array<i64: 1, 3, 8, 8>}, {transform_indices = @transform_1, window_bounds = array<i64: 1, 3, 8, 8>}, {transform_indices = @transform_2, window_bounds = array<i64: 1, 1, 8, 8>}, {transform_indices = @transform_3, window_bounds = array<i64: 1, 1, 1, 1>}]} {
    %c0 = arith.constant 0 : index
    %c0_0 = arith.constant 0 : index
    %c0_1 = arith.constant 0 : index
    %c0_2 = arith.constant 0 : index
    %0 = vector.load %arg2[%c0, %c0_0, %c0_1, %c0_2] : memref<1x3x8x8xf32, #tpu.memory_space<vmem>>, vector<1x3x8x8xf32>
    %1 = vector.shape_cast %0 : vector<1x3x8x8xf32> to vector<3x8x8xf32>
    %c0_3 = arith.constant 0 : index
    %c0_4 = arith.constant 0 : index
    %c0_5 = arith.constant 0 : index
    %c0_6 = arith.constant 0 : index
    %2 = vector.load %arg3[%c0_3, %c0_4, %c0_5, %c0_6] : memref<1x3x8x8xf32, #tpu.memory_space<vmem>>, vector<1x3x8x8xf32>
    %3 = vector.shape_cast %2 : vector<1x3x8x8xf32> to vector<3x8x8xf32>
    %c0_7 = arith.constant 0 : index
    %c0_8 = arith.constant 0 : index
    %c0_9 = arith.constant 0 : index
    %c0_10 = arith.constant 0 : index
    %4 = vector.load %arg4[%c0_7, %c0_8, %c0_9, %c0_10] : memref<1x1x8x8xf32, #tpu.memory_space<vmem>>, vector<1x1x8x8xf32>
    %5 = vector.shape_cast %4 : vector<1x1x8x8xf32> to vector<1x8x8xf32>
    %cst = arith.constant -5.000000e+00 : f32
    %6 = vector.broadcast %cst : f32 to vector<1x8x8xf32>
    %7 = arith.mulf %6, %5 : vector<1x8x8xf32>
    %cst_11 = arith.constant 6.000000e+00 : f32
    %8 = vector.broadcast %cst_11 : f32 to vector<1x8x8xf32>
    %9 = arith.addf %8, %7 : vector<1x8x8xf32>
    %10 = arith.subf %1, %3 : vector<3x8x8xf32>
    %11 = math.absf %10 : vector<3x8x8xf32>
    %12 = vector.broadcast %9 : vector<1x8x8xf32> to vector<3x8x8xf32>
    %13 = arith.mulf %11, %12 : vector<3x8x8xf32>
    %14 = vector.shape_cast %13 : vector<3x8x8xf32> to vector<1x3x8x8xf32>
    %cst_12 = arith.constant dense<0.000000e+00> : vector<1xf32>
    %15 = vector.multi_reduction <add>, %14, %cst_12 [1, 2, 3] : vector<1x3x8x8xf32> to vector<1xf32>
    %16 = vector.shape_cast %15 : vector<1xf32> to vector<1x1x1x1xf32>
    %17 = vector.extract %16[0, 0, 0, 0] : f32 from vector<1x1x1x1xf32>
    %18 = vector.broadcast %17 : f32 to vector<1x1x1x1xf32>
    %c0_13 = arith.constant 0 : index
    %c0_14 = arith.constant 0 : index
    %c0_15 = arith.constant 0 : index
    %c0_16 = arith.constant 0 : index
    %19 = vector.load %arg5[%c0_13, %c0_14, %c0_15, %c0_16] : memref<1x1x1x1xf32, #tpu.memory_space<vmem>>, vector<1x1x1x1xf32>
    tpu.vector_store %arg5[%c0_13, %c0_14, %c0_15, %c0_16], %18 {strides = array<i32>} : memref<1x1x1x1xf32, #tpu.memory_space<vmem>>, vector<1x1x1x1xf32>,
    return
  }
  func.func @transform_0(%arg0: i32, %arg1: i32) -> (i32, i32, i32, i32) {
    %c0_i32 = arith.constant 0 : i32
    %c0_i32_0 = arith.constant 0 : i32
    %c0_i32_1 = arith.constant 0 : i32
    return %arg0, %c0_i32, %arg1, %c0_i32_0 : i32, i32, i32, i32
  }
  func.func @transform_1(%arg0: i32, %arg1: i32) -> (i32, i32, i32, i32) {
    %c0_i32 = arith.constant 0 : i32
    %c0_i32_0 = arith.constant 0 : i32
    %c0_i32_1 = arith.constant 0 : i32
    return %arg0, %c0_i32, %arg1, %c0_i32_0 : i32, i32, i32, i32
  }
  func.func @transform_2(%arg0: i32, %arg1: i32) -> (i32, i32, i32, i32) {
    %c0_i32 = arith.constant 0 : i32
    %c0_i32_0 = arith.constant 0 : i32
    %c0_i32_1 = arith.constant 0 : i32
    return %arg0, %c0_i32, %arg1, %c0_i32_0 : i32, i32, i32, i32
  }
  func.func @transform_3(%arg0: i32, %arg1: i32) -> (i32, i32, i32, i32) {
    %c0_i32 = arith.constant 0 : i32
    %c0_i32_0 = arith.constant 0 : i32
    %c0_i32_1 = arith.constant 0 : i32
    return %arg0, %arg1, %c0_i32, %c0_i32_0 : i32, i32, i32, i32
  }
}

module attributes {stable_mosaic.version = 11 : i64} {
  func.func @_feat_kernel(%arg0: i32, %arg1: i32, %arg2: memref<1x16x64xf32, #tpu.memory_space<vmem>>, %arg3: memref<1x16x64xf32, #tpu.memory_space<vmem>>, %arg4: memref<1x16x64xf32, #tpu.memory_space<vmem>>, %arg5: memref<1x1x1xf32, #tpu.memory_space<vmem>>, %arg6: memref<1x1x1xf32, #tpu.memory_space<vmem>>, %arg7: memref<1x1xf32, #tpu.memory_space<vmem>>, %arg8: memref<16x16xf32, #tpu.memory_space<vmem>>, %arg9: memref<16x16xf32, #tpu.memory_space<vmem>>, %arg10: memref<16x16xf32, #tpu.memory_space<vmem>>) attributes {dimension_semantics = [#tpu.dimension_semantics<parallel>, #tpu.dimension_semantics<arbitrary>], iteration_bounds = array<i64: 2, 1>, scalar_prefetch = 0 : i64, scratch_operands = 4 : i64, tpu.core_type = #tpu.core_type<tc>, window_params = [{transform_indices = @transform_0, window_bounds = array<i64: 1, 16, 64>}, {transform_indices = @transform_1, window_bounds = array<i64: 1, 16, 64>}, {transform_indices = @transform_2, window_bounds = array<i64: 1, 16, 64>}, {transform_indices = @transform_3, window_bounds = array<i64: 1, 1, 1>}, {transform_indices = @transform_4, window_bounds = array<i64: 1, 1, 1>}]} {
    %c0_i32 = arith.constant 0 : i32
    %0 = arith.cmpi eq, %arg1, %c0_i32 : i32
    %1 = arith.extui %0 : i1 to i32
    %c0_i32_0 = arith.constant 0 : i32
    %2 = arith.cmpi ne, %1, %c0_i32_0 : i32
    scf.if %2 {
      %cst_31 = arith.constant 0.000000e+00 : f32
      %41 = vector.broadcast %cst_31 : f32 to vector<1x1xf32>
      %c0_32 = arith.constant 0 : index
      %c0_33 = arith.constant 0 : index
      %42 = vector.load %arg7[%c0_32, %c0_33] : memref<1x1xf32, #tpu.memory_space<vmem>>, vector<1x1xf32>
      tpu.vector_store %arg7[%c0_32, %c0_33], %41 {strides = array<i32>} : memref<1x1xf32, #tpu.memory_space<vmem>>, vector<1x1xf32>,
      %cst_34 = arith.constant 0.000000e+00 : f32
      %43 = vector.broadcast %cst_34 : f32 to vector<16x16xf32>
      %c0_35 = arith.constant 0 : index
      %c0_36 = arith.constant 0 : index
      %44 = vector.load %arg8[%c0_35, %c0_36] : memref<16x16xf32, #tpu.memory_space<vmem>>, vector<16x16xf32>
      tpu.vector_store %arg8[%c0_35, %c0_36], %43 {strides = array<i32>} : memref<16x16xf32, #tpu.memory_space<vmem>>, vector<16x16xf32>,
      %cst_37 = arith.constant 0.000000e+00 : f32
      %45 = vector.broadcast %cst_37 : f32 to vector<16x16xf32>
      %c0_38 = arith.constant 0 : index
      %c0_39 = arith.constant 0 : index
      %46 = vector.load %arg9[%c0_38, %c0_39] : memref<16x16xf32, #tpu.memory_space<vmem>>, vector<16x16xf32>
      tpu.vector_store %arg9[%c0_38, %c0_39], %45 {strides = array<i32>} : memref<16x16xf32, #tpu.memory_space<vmem>>, vector<16x16xf32>,
      %cst_40 = arith.constant 0.000000e+00 : f32
      %47 = vector.broadcast %cst_40 : f32 to vector<16x16xf32>
      %c0_41 = arith.constant 0 : index
      %c0_42 = arith.constant 0 : index
      %48 = vector.load %arg10[%c0_41, %c0_42] : memref<16x16xf32, #tpu.memory_space<vmem>>, vector<16x16xf32>
      tpu.vector_store %arg10[%c0_41, %c0_42], %47 {strides = array<i32>} : memref<16x16xf32, #tpu.memory_space<vmem>>, vector<16x16xf32>,
    } else {
    }
    %c0 = arith.constant 0 : index
    %c0_1 = arith.constant 0 : index
    %c0_2 = arith.constant 0 : index
    %3 = vector.load %arg2[%c0, %c0_1, %c0_2] : memref<1x16x64xf32, #tpu.memory_space<vmem>>, vector<1x16x64xf32>
    %4 = vector.shape_cast %3 : vector<1x16x64xf32> to vector<16x64xf32>
    %c0_3 = arith.constant 0 : index
    %c0_4 = arith.constant 0 : index
    %c0_5 = arith.constant 0 : index
    %5 = vector.load %arg3[%c0_3, %c0_4, %c0_5] : memref<1x16x64xf32, #tpu.memory_space<vmem>>, vector<1x16x64xf32>
    %6 = vector.shape_cast %5 : vector<1x16x64xf32> to vector<16x64xf32>
    %c0_6 = arith.constant 0 : index
    %c0_7 = arith.constant 0 : index
    %c0_8 = arith.constant 0 : index
    %7 = vector.load %arg4[%c0_6, %c0_7, %c0_8] : memref<1x16x64xf32, #tpu.memory_space<vmem>>, vector<1x16x64xf32>
    %8 = vector.shape_cast %7 : vector<1x16x64xf32> to vector<16x64xf32>
    %c0_9 = arith.constant 0 : index
    %c0_10 = arith.constant 0 : index
    %9 = vector.load %arg7[%c0_9, %c0_10] : memref<1x1xf32, #tpu.memory_space<vmem>>, vector<1x1xf32>
    %10 = arith.subf %4, %8 : vector<16x64xf32>
    %11 = math.absf %10 : vector<16x64xf32>
    %12 = vector.shape_cast %11 : vector<16x64xf32> to vector<1x16x64xf32>
    %cst = arith.constant dense<0.000000e+00> : vector<1xf32>
    %13 = vector.multi_reduction <add>, %12, %cst [1, 2] : vector<1x16x64xf32> to vector<1xf32>
    %14 = vector.shape_cast %13 : vector<1xf32> to vector<1x1x1xf32>
    %15 = vector.extract %14[0, 0, 0] : f32 from vector<1x1x1xf32>
    %16 = arith.subf %6, %8 : vector<16x64xf32>
    %17 = math.absf %16 : vector<16x64xf32>
    %18 = vector.shape_cast %17 : vector<16x64xf32> to vector<1x16x64xf32>
    %cst_11 = arith.constant dense<0.000000e+00> : vector<1xf32>
    %19 = vector.multi_reduction <add>, %18, %cst_11 [1, 2] : vector<1x16x64xf32> to vector<1xf32>
    %20 = vector.shape_cast %19 : vector<1xf32> to vector<1x1x1xf32>
    %21 = vector.extract %20[0, 0, 0] : f32 from vector<1x1x1xf32>
    %22 = arith.addf %15, %21 : f32
    %23 = vector.broadcast %22 : f32 to vector<1x1xf32>
    %24 = arith.addf %9, %23 : vector<1x1xf32>
    %c0_12 = arith.constant 0 : index
    %c0_13 = arith.constant 0 : index
    %25 = vector.load %arg7[%c0_12, %c0_13] : memref<1x1xf32, #tpu.memory_space<vmem>>, vector<1x1xf32>
    tpu.vector_store %arg7[%c0_12, %c0_13], %24 {strides = array<i32>} : memref<1x1xf32, #tpu.memory_space<vmem>>, vector<1x1xf32>,
    %c0_14 = arith.constant 0 : index
    %c0_15 = arith.constant 0 : index
    %26 = vector.load %arg8[%c0_14, %c0_15] : memref<16x16xf32, #tpu.memory_space<vmem>>, vector<16x16xf32>
    %cst_16 = arith.constant dense<0.000000e+00> : vector<16x16xf32>
    %27 = tpu.matmul %4, %4, %cst_16 {dimension_numbers = #tpu.dot_dimension_numbers<[1], [1], [0], [0], [0, 0, 1, 0], [], []>} : vector<16x64xf32>, vector<16x64xf32>, vector<16x16xf32> -> vector<16x16xf32>
    %28 = arith.addf %26, %27 : vector<16x16xf32>
    %c0_17 = arith.constant 0 : index
    %c0_18 = arith.constant 0 : index
    %29 = vector.load %arg8[%c0_17, %c0_18] : memref<16x16xf32, #tpu.memory_space<vmem>>, vector<16x16xf32>
    tpu.vector_store %arg8[%c0_17, %c0_18], %28 {strides = array<i32>} : memref<16x16xf32, #tpu.memory_space<vmem>>, vector<16x16xf32>,
    %c0_19 = arith.constant 0 : index
    %c0_20 = arith.constant 0 : index
    %30 = vector.load %arg9[%c0_19, %c0_20] : memref<16x16xf32, #tpu.memory_space<vmem>>, vector<16x16xf32>
    %cst_21 = arith.constant dense<0.000000e+00> : vector<16x16xf32>
    %31 = tpu.matmul %6, %6, %cst_21 {dimension_numbers = #tpu.dot_dimension_numbers<[1], [1], [0], [0], [0, 0, 1, 0], [], []>} : vector<16x64xf32>, vector<16x64xf32>, vector<16x16xf32> -> vector<16x16xf32>
    %32 = arith.addf %30, %31 : vector<16x16xf32>
    %c0_22 = arith.constant 0 : index
    %c0_23 = arith.constant 0 : index
    %33 = vector.load %arg9[%c0_22, %c0_23] : memref<16x16xf32, #tpu.memory_space<vmem>>, vector<16x16xf32>
    tpu.vector_store %arg9[%c0_22, %c0_23], %32 {strides = array<i32>} : memref<16x16xf32, #tpu.memory_space<vmem>>, vector<16x16xf32>,
    %c0_24 = arith.constant 0 : index
    %c0_25 = arith.constant 0 : index
    %34 = vector.load %arg10[%c0_24, %c0_25] : memref<16x16xf32, #tpu.memory_space<vmem>>, vector<16x16xf32>
    %cst_26 = arith.constant dense<0.000000e+00> : vector<16x16xf32>
    %35 = tpu.matmul %8, %8, %cst_26 {dimension_numbers = #tpu.dot_dimension_numbers<[1], [1], [0], [0], [0, 0, 1, 0], [], []>} : vector<16x64xf32>, vector<16x64xf32>, vector<16x16xf32> -> vector<16x16xf32>
    %36 = arith.addf %34, %35 : vector<16x16xf32>
    %c0_27 = arith.constant 0 : index
    %c0_28 = arith.constant 0 : index
    %37 = vector.load %arg10[%c0_27, %c0_28] : memref<16x16xf32, #tpu.memory_space<vmem>>, vector<16x16xf32>
    tpu.vector_store %arg10[%c0_27, %c0_28], %36 {strides = array<i32>} : memref<16x16xf32, #tpu.memory_space<vmem>>, vector<16x16xf32>,
    %c0_i32_29 = arith.constant 0 : i32
    %38 = arith.cmpi eq, %arg1, %c0_i32_29 : i32
    %39 = arith.extui %38 : i1 to i32
    %c0_i32_30 = arith.constant 0 : i32
    %40 = arith.cmpi ne, %39, %c0_i32_30 : i32
    scf.if %40 {
      %c0_31 = arith.constant 0 : index
      %c0_32 = arith.constant 0 : index
      %41 = vector.load %arg8[%c0_31, %c0_32] : memref<16x16xf32, #tpu.memory_space<vmem>>, vector<16x16xf32>
      %cst_33 = arith.constant 9.765625E-4 : f32
      %42 = vector.broadcast %cst_33 : f32 to vector<16x16xf32>
      %43 = arith.mulf %41, %42 : vector<16x16xf32>
      %c0_34 = arith.constant 0 : index
      %c0_35 = arith.constant 0 : index
      %44 = vector.load %arg9[%c0_34, %c0_35] : memref<16x16xf32, #tpu.memory_space<vmem>>, vector<16x16xf32>
      %cst_36 = arith.constant 9.765625E-4 : f32
      %45 = vector.broadcast %cst_36 : f32 to vector<16x16xf32>
      %46 = arith.mulf %44, %45 : vector<16x16xf32>
      %c0_37 = arith.constant 0 : index
      %c0_38 = arith.constant 0 : index
      %47 = vector.load %arg10[%c0_37, %c0_38] : memref<16x16xf32, #tpu.memory_space<vmem>>, vector<16x16xf32>
      %cst_39 = arith.constant 9.765625E-4 : f32
      %48 = vector.broadcast %cst_39 : f32 to vector<16x16xf32>
      %49 = arith.mulf %47, %48 : vector<16x16xf32>
      %50 = arith.subf %43, %49 : vector<16x16xf32>
      %51 = math.absf %50 : vector<16x16xf32>
      %52 = vector.shape_cast %51 : vector<16x16xf32> to vector<1x16x16xf32>
      %cst_40 = arith.constant dense<0.000000e+00> : vector<1xf32>
      %53 = vector.multi_reduction <add>, %52, %cst_40 [1, 2] : vector<1x16x16xf32> to vector<1xf32>
      %54 = vector.shape_cast %53 : vector<1xf32> to vector<1x1x1xf32>
      %55 = vector.extract %54[0, 0, 0] : f32 from vector<1x1x1xf32>
      %56 = arith.subf %46, %49 : vector<16x16xf32>
      %57 = math.absf %56 : vector<16x16xf32>
      %58 = vector.shape_cast %57 : vector<16x16xf32> to vector<1x16x16xf32>
      %cst_41 = arith.constant dense<0.000000e+00> : vector<1xf32>
      %59 = vector.multi_reduction <add>, %58, %cst_41 [1, 2] : vector<1x16x16xf32> to vector<1xf32>
      %60 = vector.shape_cast %59 : vector<1xf32> to vector<1x1x1xf32>
      %61 = vector.extract %60[0, 0, 0] : f32 from vector<1x1x1xf32>
      %62 = arith.addf %55, %61 : f32
      %cst_42 = arith.constant 0.001953125 : f32
      %63 = arith.mulf %62, %cst_42 : f32
      %c0_43 = arith.constant 0 : index
      %c0_44 = arith.constant 0 : index
      %64 = vector.load %arg7[%c0_43, %c0_44] : memref<1x1xf32, #tpu.memory_space<vmem>>, vector<1x1xf32>
      %cst_45 = arith.constant 4.8828125E-4 : f32
      %65 = vector.broadcast %cst_45 : f32 to vector<1x1xf32>
      %66 = arith.mulf %64, %65 : vector<1x1xf32>
      %67 = vector.shape_cast %66 : vector<1x1xf32> to vector<1x1x1xf32>
      %c0_46 = arith.constant 0 : index
      %c0_47 = arith.constant 0 : index
      %c0_48 = arith.constant 0 : index
      %68 = vector.load %arg5[%c0_46, %c0_47, %c0_48] : memref<1x1x1xf32, #tpu.memory_space<vmem>>, vector<1x1x1xf32>
      tpu.vector_store %arg5[%c0_46, %c0_47, %c0_48], %67 {strides = array<i32>} : memref<1x1x1xf32, #tpu.memory_space<vmem>>, vector<1x1x1xf32>,
      %69 = vector.broadcast %63 : f32 to vector<1x1x1xf32>
      %c0_49 = arith.constant 0 : index
      %c0_50 = arith.constant 0 : index
      %c0_51 = arith.constant 0 : index
      %70 = vector.load %arg6[%c0_49, %c0_50, %c0_51] : memref<1x1x1xf32, #tpu.memory_space<vmem>>, vector<1x1x1xf32>
      tpu.vector_store %arg6[%c0_49, %c0_50, %c0_51], %69 {strides = array<i32>} : memref<1x1x1xf32, #tpu.memory_space<vmem>>, vector<1x1x1xf32>,
    } else {
    }
    return
  }
  func.func @transform_0(%arg0: i32, %arg1: i32) -> (i32, i32, i32) {
    %c0_i32 = arith.constant 0 : i32
    %c0_i32_0 = arith.constant 0 : i32
    return %arg0, %c0_i32, %arg1 : i32, i32, i32
  }
  func.func @transform_1(%arg0: i32, %arg1: i32) -> (i32, i32, i32) {
    %c0_i32 = arith.constant 0 : i32
    %c0_i32_0 = arith.constant 0 : i32
    return %arg0, %c0_i32, %arg1 : i32, i32, i32
  }
  func.func @transform_2(%arg0: i32, %arg1: i32) -> (i32, i32, i32) {
    %c0_i32 = arith.constant 0 : i32
    %c0_i32_0 = arith.constant 0 : i32
    return %arg0, %c0_i32, %arg1 : i32, i32, i32
  }
  func.func @transform_3(%arg0: i32, %arg1: i32) -> (i32, i32, i32) {
    %c0_i32 = arith.constant 0 : i32
    %c0_i32_0 = arith.constant 0 : i32
    %c0_i32_1 = arith.constant 0 : i32
    return %arg0, %c0_i32, %c0_i32_0 : i32, i32, i32
  }
  func.func @transform_4(%arg0: i32, %arg1: i32) -> (i32, i32, i32) {
    %c0_i32 = arith.constant 0 : i32
    %c0_i32_0 = arith.constant 0 : i32
    %c0_i32_1 = arith.constant 0 : i32
    return %arg0, %c0_i32, %c0_i32_0 : i32, i32, i32
  }
}

module attributes {stable_mosaic.version = 11 : i64} {
  func.func @_feat_kernel(%arg0: i32, %arg1: i32, %arg2: memref<1x32x16xf32, #tpu.memory_space<vmem>>, %arg3: memref<1x32x16xf32, #tpu.memory_space<vmem>>, %arg4: memref<1x32x16xf32, #tpu.memory_space<vmem>>, %arg5: memref<1x1x1xf32, #tpu.memory_space<vmem>>, %arg6: memref<1x1x1xf32, #tpu.memory_space<vmem>>, %arg7: memref<1x1xf32, #tpu.memory_space<vmem>>, %arg8: memref<32x32xf32, #tpu.memory_space<vmem>>, %arg9: memref<32x32xf32, #tpu.memory_space<vmem>>, %arg10: memref<32x32xf32, #tpu.memory_space<vmem>>) attributes {dimension_semantics = [#tpu.dimension_semantics<parallel>, #tpu.dimension_semantics<arbitrary>], iteration_bounds = array<i64: 2, 1>, scalar_prefetch = 0 : i64, scratch_operands = 4 : i64, tpu.core_type = #tpu.core_type<tc>, window_params = [{transform_indices = @transform_0, window_bounds = array<i64: 1, 32, 16>}, {transform_indices = @transform_1, window_bounds = array<i64: 1, 32, 16>}, {transform_indices = @transform_2, window_bounds = array<i64: 1, 32, 16>}, {transform_indices = @transform_3, window_bounds = array<i64: 1, 1, 1>}, {transform_indices = @transform_4, window_bounds = array<i64: 1, 1, 1>}]} {
    %c0_i32 = arith.constant 0 : i32
    %0 = arith.cmpi eq, %arg1, %c0_i32 : i32
    %1 = arith.extui %0 : i1 to i32
    %c0_i32_0 = arith.constant 0 : i32
    %2 = arith.cmpi ne, %1, %c0_i32_0 : i32
    scf.if %2 {
      %cst_31 = arith.constant 0.000000e+00 : f32
      %41 = vector.broadcast %cst_31 : f32 to vector<1x1xf32>
      %c0_32 = arith.constant 0 : index
      %c0_33 = arith.constant 0 : index
      %42 = vector.load %arg7[%c0_32, %c0_33] : memref<1x1xf32, #tpu.memory_space<vmem>>, vector<1x1xf32>
      tpu.vector_store %arg7[%c0_32, %c0_33], %41 {strides = array<i32>} : memref<1x1xf32, #tpu.memory_space<vmem>>, vector<1x1xf32>,
      %cst_34 = arith.constant 0.000000e+00 : f32
      %43 = vector.broadcast %cst_34 : f32 to vector<32x32xf32>
      %c0_35 = arith.constant 0 : index
      %c0_36 = arith.constant 0 : index
      %44 = vector.load %arg8[%c0_35, %c0_36] : memref<32x32xf32, #tpu.memory_space<vmem>>, vector<32x32xf32>
      tpu.vector_store %arg8[%c0_35, %c0_36], %43 {strides = array<i32>} : memref<32x32xf32, #tpu.memory_space<vmem>>, vector<32x32xf32>,
      %cst_37 = arith.constant 0.000000e+00 : f32
      %45 = vector.broadcast %cst_37 : f32 to vector<32x32xf32>
      %c0_38 = arith.constant 0 : index
      %c0_39 = arith.constant 0 : index
      %46 = vector.load %arg9[%c0_38, %c0_39] : memref<32x32xf32, #tpu.memory_space<vmem>>, vector<32x32xf32>
      tpu.vector_store %arg9[%c0_38, %c0_39], %45 {strides = array<i32>} : memref<32x32xf32, #tpu.memory_space<vmem>>, vector<32x32xf32>,
      %cst_40 = arith.constant 0.000000e+00 : f32
      %47 = vector.broadcast %cst_40 : f32 to vector<32x32xf32>
      %c0_41 = arith.constant 0 : index
      %c0_42 = arith.constant 0 : index
      %48 = vector.load %arg10[%c0_41, %c0_42] : memref<32x32xf32, #tpu.memory_space<vmem>>, vector<32x32xf32>
      tpu.vector_store %arg10[%c0_41, %c0_42], %47 {strides = array<i32>} : memref<32x32xf32, #tpu.memory_space<vmem>>, vector<32x32xf32>,
    } else {
    }
    %c0 = arith.constant 0 : index
    %c0_1 = arith.constant 0 : index
    %c0_2 = arith.constant 0 : index
    %3 = vector.load %arg2[%c0, %c0_1, %c0_2] : memref<1x32x16xf32, #tpu.memory_space<vmem>>, vector<1x32x16xf32>
    %4 = vector.shape_cast %3 : vector<1x32x16xf32> to vector<32x16xf32>
    %c0_3 = arith.constant 0 : index
    %c0_4 = arith.constant 0 : index
    %c0_5 = arith.constant 0 : index
    %5 = vector.load %arg3[%c0_3, %c0_4, %c0_5] : memref<1x32x16xf32, #tpu.memory_space<vmem>>, vector<1x32x16xf32>
    %6 = vector.shape_cast %5 : vector<1x32x16xf32> to vector<32x16xf32>
    %c0_6 = arith.constant 0 : index
    %c0_7 = arith.constant 0 : index
    %c0_8 = arith.constant 0 : index
    %7 = vector.load %arg4[%c0_6, %c0_7, %c0_8] : memref<1x32x16xf32, #tpu.memory_space<vmem>>, vector<1x32x16xf32>
    %8 = vector.shape_cast %7 : vector<1x32x16xf32> to vector<32x16xf32>
    %c0_9 = arith.constant 0 : index
    %c0_10 = arith.constant 0 : index
    %9 = vector.load %arg7[%c0_9, %c0_10] : memref<1x1xf32, #tpu.memory_space<vmem>>, vector<1x1xf32>
    %10 = arith.subf %4, %8 : vector<32x16xf32>
    %11 = math.absf %10 : vector<32x16xf32>
    %12 = vector.shape_cast %11 : vector<32x16xf32> to vector<1x32x16xf32>
    %cst = arith.constant dense<0.000000e+00> : vector<1xf32>
    %13 = vector.multi_reduction <add>, %12, %cst [1, 2] : vector<1x32x16xf32> to vector<1xf32>
    %14 = vector.shape_cast %13 : vector<1xf32> to vector<1x1x1xf32>
    %15 = vector.extract %14[0, 0, 0] : f32 from vector<1x1x1xf32>
    %16 = arith.subf %6, %8 : vector<32x16xf32>
    %17 = math.absf %16 : vector<32x16xf32>
    %18 = vector.shape_cast %17 : vector<32x16xf32> to vector<1x32x16xf32>
    %cst_11 = arith.constant dense<0.000000e+00> : vector<1xf32>
    %19 = vector.multi_reduction <add>, %18, %cst_11 [1, 2] : vector<1x32x16xf32> to vector<1xf32>
    %20 = vector.shape_cast %19 : vector<1xf32> to vector<1x1x1xf32>
    %21 = vector.extract %20[0, 0, 0] : f32 from vector<1x1x1xf32>
    %22 = arith.addf %15, %21 : f32
    %23 = vector.broadcast %22 : f32 to vector<1x1xf32>
    %24 = arith.addf %9, %23 : vector<1x1xf32>
    %c0_12 = arith.constant 0 : index
    %c0_13 = arith.constant 0 : index
    %25 = vector.load %arg7[%c0_12, %c0_13] : memref<1x1xf32, #tpu.memory_space<vmem>>, vector<1x1xf32>
    tpu.vector_store %arg7[%c0_12, %c0_13], %24 {strides = array<i32>} : memref<1x1xf32, #tpu.memory_space<vmem>>, vector<1x1xf32>,
    %c0_14 = arith.constant 0 : index
    %c0_15 = arith.constant 0 : index
    %26 = vector.load %arg8[%c0_14, %c0_15] : memref<32x32xf32, #tpu.memory_space<vmem>>, vector<32x32xf32>
    %cst_16 = arith.constant dense<0.000000e+00> : vector<32x32xf32>
    %27 = tpu.matmul %4, %4, %cst_16 {dimension_numbers = #tpu.dot_dimension_numbers<[1], [1], [0], [0], [0, 0, 1, 0], [], []>} : vector<32x16xf32>, vector<32x16xf32>, vector<32x32xf32> -> vector<32x32xf32>
    %28 = arith.addf %26, %27 : vector<32x32xf32>
    %c0_17 = arith.constant 0 : index
    %c0_18 = arith.constant 0 : index
    %29 = vector.load %arg8[%c0_17, %c0_18] : memref<32x32xf32, #tpu.memory_space<vmem>>, vector<32x32xf32>
    tpu.vector_store %arg8[%c0_17, %c0_18], %28 {strides = array<i32>} : memref<32x32xf32, #tpu.memory_space<vmem>>, vector<32x32xf32>,
    %c0_19 = arith.constant 0 : index
    %c0_20 = arith.constant 0 : index
    %30 = vector.load %arg9[%c0_19, %c0_20] : memref<32x32xf32, #tpu.memory_space<vmem>>, vector<32x32xf32>
    %cst_21 = arith.constant dense<0.000000e+00> : vector<32x32xf32>
    %31 = tpu.matmul %6, %6, %cst_21 {dimension_numbers = #tpu.dot_dimension_numbers<[1], [1], [0], [0], [0, 0, 1, 0], [], []>} : vector<32x16xf32>, vector<32x16xf32>, vector<32x32xf32> -> vector<32x32xf32>
    %32 = arith.addf %30, %31 : vector<32x32xf32>
    %c0_22 = arith.constant 0 : index
    %c0_23 = arith.constant 0 : index
    %33 = vector.load %arg9[%c0_22, %c0_23] : memref<32x32xf32, #tpu.memory_space<vmem>>, vector<32x32xf32>
    tpu.vector_store %arg9[%c0_22, %c0_23], %32 {strides = array<i32>} : memref<32x32xf32, #tpu.memory_space<vmem>>, vector<32x32xf32>,
    %c0_24 = arith.constant 0 : index
    %c0_25 = arith.constant 0 : index
    %34 = vector.load %arg10[%c0_24, %c0_25] : memref<32x32xf32, #tpu.memory_space<vmem>>, vector<32x32xf32>
    %cst_26 = arith.constant dense<0.000000e+00> : vector<32x32xf32>
    %35 = tpu.matmul %8, %8, %cst_26 {dimension_numbers = #tpu.dot_dimension_numbers<[1], [1], [0], [0], [0, 0, 1, 0], [], []>} : vector<32x16xf32>, vector<32x16xf32>, vector<32x32xf32> -> vector<32x32xf32>
    %36 = arith.addf %34, %35 : vector<32x32xf32>
    %c0_27 = arith.constant 0 : index
    %c0_28 = arith.constant 0 : index
    %37 = vector.load %arg10[%c0_27, %c0_28] : memref<32x32xf32, #tpu.memory_space<vmem>>, vector<32x32xf32>
    tpu.vector_store %arg10[%c0_27, %c0_28], %36 {strides = array<i32>} : memref<32x32xf32, #tpu.memory_space<vmem>>, vector<32x32xf32>,
    %c0_i32_29 = arith.constant 0 : i32
    %38 = arith.cmpi eq, %arg1, %c0_i32_29 : i32
    %39 = arith.extui %38 : i1 to i32
    %c0_i32_30 = arith.constant 0 : i32
    %40 = arith.cmpi ne, %39, %c0_i32_30 : i32
    scf.if %40 {
      %c0_31 = arith.constant 0 : index
      %c0_32 = arith.constant 0 : index
      %41 = vector.load %arg8[%c0_31, %c0_32] : memref<32x32xf32, #tpu.memory_space<vmem>>, vector<32x32xf32>
      %cst_33 = arith.constant 0.001953125 : f32
      %42 = vector.broadcast %cst_33 : f32 to vector<32x32xf32>
      %43 = arith.mulf %41, %42 : vector<32x32xf32>
      %c0_34 = arith.constant 0 : index
      %c0_35 = arith.constant 0 : index
      %44 = vector.load %arg9[%c0_34, %c0_35] : memref<32x32xf32, #tpu.memory_space<vmem>>, vector<32x32xf32>
      %cst_36 = arith.constant 0.001953125 : f32
      %45 = vector.broadcast %cst_36 : f32 to vector<32x32xf32>
      %46 = arith.mulf %44, %45 : vector<32x32xf32>
      %c0_37 = arith.constant 0 : index
      %c0_38 = arith.constant 0 : index
      %47 = vector.load %arg10[%c0_37, %c0_38] : memref<32x32xf32, #tpu.memory_space<vmem>>, vector<32x32xf32>
      %cst_39 = arith.constant 0.001953125 : f32
      %48 = vector.broadcast %cst_39 : f32 to vector<32x32xf32>
      %49 = arith.mulf %47, %48 : vector<32x32xf32>
      %50 = arith.subf %43, %49 : vector<32x32xf32>
      %51 = math.absf %50 : vector<32x32xf32>
      %52 = vector.shape_cast %51 : vector<32x32xf32> to vector<1x32x32xf32>
      %cst_40 = arith.constant dense<0.000000e+00> : vector<1xf32>
      %53 = vector.multi_reduction <add>, %52, %cst_40 [1, 2] : vector<1x32x32xf32> to vector<1xf32>
      %54 = vector.shape_cast %53 : vector<1xf32> to vector<1x1x1xf32>
      %55 = vector.extract %54[0, 0, 0] : f32 from vector<1x1x1xf32>
      %56 = arith.subf %46, %49 : vector<32x32xf32>
      %57 = math.absf %56 : vector<32x32xf32>
      %58 = vector.shape_cast %57 : vector<32x32xf32> to vector<1x32x32xf32>
      %cst_41 = arith.constant dense<0.000000e+00> : vector<1xf32>
      %59 = vector.multi_reduction <add>, %58, %cst_41 [1, 2] : vector<1x32x32xf32> to vector<1xf32>
      %60 = vector.shape_cast %59 : vector<1xf32> to vector<1x1x1xf32>
      %61 = vector.extract %60[0, 0, 0] : f32 from vector<1x1x1xf32>
      %62 = arith.addf %55, %61 : f32
      %cst_42 = arith.constant 4.8828125E-4 : f32
      %63 = arith.mulf %62, %cst_42 : f32
      %c0_43 = arith.constant 0 : index
      %c0_44 = arith.constant 0 : index
      %64 = vector.load %arg7[%c0_43, %c0_44] : memref<1x1xf32, #tpu.memory_space<vmem>>, vector<1x1xf32>
      %cst_45 = arith.constant 9.765625E-4 : f32
      %65 = vector.broadcast %cst_45 : f32 to vector<1x1xf32>
      %66 = arith.mulf %64, %65 : vector<1x1xf32>
      %67 = vector.shape_cast %66 : vector<1x1xf32> to vector<1x1x1xf32>
      %c0_46 = arith.constant 0 : index
      %c0_47 = arith.constant 0 : index
      %c0_48 = arith.constant 0 : index
      %68 = vector.load %arg5[%c0_46, %c0_47, %c0_48] : memref<1x1x1xf32, #tpu.memory_space<vmem>>, vector<1x1x1xf32>
      tpu.vector_store %arg5[%c0_46, %c0_47, %c0_48], %67 {strides = array<i32>} : memref<1x1x1xf32, #tpu.memory_space<vmem>>, vector<1x1x1xf32>,
      %69 = vector.broadcast %63 : f32 to vector<1x1x1xf32>
      %c0_49 = arith.constant 0 : index
      %c0_50 = arith.constant 0 : index
      %c0_51 = arith.constant 0 : index
      %70 = vector.load %arg6[%c0_49, %c0_50, %c0_51] : memref<1x1x1xf32, #tpu.memory_space<vmem>>, vector<1x1x1xf32>
      tpu.vector_store %arg6[%c0_49, %c0_50, %c0_51], %69 {strides = array<i32>} : memref<1x1x1xf32, #tpu.memory_space<vmem>>, vector<1x1x1xf32>,
    } else {
    }
    return
  }
  func.func @transform_0(%arg0: i32, %arg1: i32) -> (i32, i32, i32) {
    %c0_i32 = arith.constant 0 : i32
    %c0_i32_0 = arith.constant 0 : i32
    return %arg0, %c0_i32, %arg1 : i32, i32, i32
  }
  func.func @transform_1(%arg0: i32, %arg1: i32) -> (i32, i32, i32) {
    %c0_i32 = arith.constant 0 : i32
    %c0_i32_0 = arith.constant 0 : i32
    return %arg0, %c0_i32, %arg1 : i32, i32, i32
  }
  func.func @transform_2(%arg0: i32, %arg1: i32) -> (i32, i32, i32) {
    %c0_i32 = arith.constant 0 : i32
    %c0_i32_0 = arith.constant 0 : i32
    return %arg0, %c0_i32, %arg1 : i32, i32, i32
  }
  func.func @transform_3(%arg0: i32, %arg1: i32) -> (i32, i32, i32) {
    %c0_i32 = arith.constant 0 : i32
    %c0_i32_0 = arith.constant 0 : i32
    %c0_i32_1 = arith.constant 0 : i32
    return %arg0, %c0_i32, %c0_i32_0 : i32, i32, i32
  }
  func.func @transform_4(%arg0: i32, %arg1: i32) -> (i32, i32, i32) {
    %c0_i32 = arith.constant 0 : i32
    %c0_i32_0 = arith.constant 0 : i32
    %c0_i32_1 = arith.constant 0 : i32
    return %arg0, %c0_i32, %c0_i32_0 : i32, i32, i32
  }
}

</mosaic_0001>

<bundles_post_ra>
// kernel: text_removal_loss.11
= control target key start
LH: loop header
LB: loop body
LE: loop exit
PB: predicated region body
PF: predicated region fallthrough
CT: control target
= control target key end

     0   :  { %s869_s0 = inlined_call_operand.hbm [shape: f32[2,3,16,16], index: 0, kind: input, shape index: {}]   ;;  %s870_s1 = inlined_call_operand.hbm [shape: f32[2,3,16,16], index: 1, kind: input, shape index: {}]   ;;  %s871_s2 = inlined_call_operand.hbm [shape: f32[2,1,16,16], index: 2, kind: input, shape index: {}]   ;;  %s872_s3 = inlined_call_operand.vmem [shape: f32[2,1,1,1], index: 3, kind: output, shape index: {}]  }
   0x1   :  { %876 = sst [smem:[#allocation12_spill]] %s870_s1 }
   0x2   :  { %8 = vsyncpa [#allocation3], 0 }
   0x3   :  { %10 = vsyncpa [#allocation3 + $0x1], 0 }
   0x4   :  { %11 = vsyncpa [#allocation5], 0 }
   0x5   :  { %13 = vsyncpa [#allocation5 + $0x1], 0  ;;  %s750_s12 = smov 0   ;;  %s752_s13 = smov 0  }
   0x6   :  { %s754_s14 = smov 0   ;;  %s756_s15 = smov 0  }
   0x7   :  { %s758_s16 = smov 0   ;;  %s760_s17 = smov 0  }
   0x8 LB: > { %877 = sst [smem:[#allocation9_spill]] %s714_s14  ;;  %s873_s18 = sadd.s32 4294967295, %s726_s17   ;;  %s726_s17 = sphi %s760_s17, %s19_s17   ;;  %s722_s16 = sphi %s758_s16, %s891_s16   ;;  %s718_s15 = sphi %s756_s15, %s890_s15   ;;  %s714_s14 = sphi %s754_s14, %s886_s14   ;;  %s710_s13 = sphi %s752_s13, %s889_s13   ;;  %s706_s12 = sphi %s750_s12, %s888_s12  }
   0x9   : > { %s31_s19 = sadd.s32 1, %s722_s16  ;;  %s40_s20 = sadd.s32 1, %s714_s14 }
   0xa   : > { %p33_p0 = scmp.ge.s32.totalorder %s31_s19, 2  ;;  %p47_p1 = scmp.ne.s32.totalorder %s714_s14, %s710_s13 }
   0xb   : > { %p48_p2 = scmp.eq.s32.totalorder %s726_s17, 0  ;;  %p53_p4 = scmp.ne.s32.totalorder %s710_s13, %s706_s12 }
   0xc   : > { %s893_s19 = smov (%p33_p0, %s31_s19), 0  ;;  %p54_p5 = scmp.eq.s32.totalorder %s873_s18, 0 }
   0xd   : > { %878 = sst [smem:[#allocation10_spill]] %s893_s19  ;;  %p49_p3 = por %p48_p2, %p47_p1 }
   0xe   : > { %s35_s21 = ssub.s32 %s722_s16, %s893_s19  ;;  %p791_p7 = por %p54_p5, %p53_p4 }
   0xf   : > { %p38_p6 = scmp.eq.s32.totalorder %s35_s21, 0  ;;  %p531_p8 = scmp.lt.s32.totalorder %s726_s17, 2 }
  0x10   : > { %s800_s24 = sand.u32 1, %s714_s14   ;;  %s509_s25 = smul.u32 48, %s722_s16 }
  0x11   : > { %s797_s23 = scalar_select %p38_p6, %s714_s14, %s40_s20  }
  0x12   : > { %s508_s26 = smul.u32 48, %s800_s24  ;;  %p804_p9 = pnand %p531_p8, %p49_p3 }
  0x13   : > { %880 = sst [smem:[#allocation11_spill]] %s797_s23  ;;  %s185_s28 = sand.u32 1, %s726_s17  }
  0x14   : > { %s882_s1 = sld [smem:[#allocation12_spill]]  ;;  %s189_s5 = scalar_lea.vmem [#allocation4], %s508_s26 }
  0x15   : > { %s199_s6 = sshll.u32 %s189_s5, 4  ;;  %p503_p10 = scmp.ge.s32.totalorder %s726_s17, 1  ;;  %s200_s6 = int_to_ptr.vmem [resolvable:$true] %s199_s6 }
  0x16   : > { %s186_s8 = scalar_lea.sflag [#allocation5], %s185_s28  ;;  %s728_s9 = smov 128  }
  0x17   : > { %s729_s10 = smov 8   ;;  %p231_p11 = scmp.lt.s32.totalorder %s726_s17, 3 }
  0x18   : > { %s172_s21 = scalar_lea.hbm %s869_s0, %s509_s25  ;;  %s165_s29 = scalar_lea.vmem [#allocation2], %s508_s26 }
  0x19   : > { %p816_p12 = pnand %p503_p10, %p231_p11  ;;  %s175_s30 = sshll.u32 %s165_s29, 4  ;;  %s176_s30 = int_to_ptr.vmem [resolvable:$true] %s175_s30 }
  0x1a   : > { %s196_s4 = scalar_lea.hbm %s882_s1, %s509_s25  ;;  %s500_s28 = sshll.u32 %s800_s24, 4 }
  0x1b   : > { %s197_s7 = sshll.u32 %s196_s4, 4  ;;  %s173_s4 = sshll.u32 %s172_s21, 4  ;;  %s198_s7 = int_to_ptr.hbm [resolvable:$true] %s197_s7  ;;  %s174_s4 = int_to_ptr.hbm [resolvable:$true] %s173_s4 }
  0x1c   : > { %527 = dma.hbm_to_vmem [thread:$0]  (!%p804_p9), %s198_s7, 768, %s200_s6, %s186_s8, %s728_s9, %s728_s9, %s729_s10  }
  0x1d   : > { %s162_s5 = scalar_lea.sflag [#allocation3], %s800_s24  ;;  %s507_s6 = sshll.u32 %s722_s16, 4 }
  0x1e   : > { %524 = dma.hbm_to_vmem [thread:$0]  (!%p804_p9), %s174_s4, 768, %s176_s30, %s162_s5, %s728_s9, %s728_s9, %s729_s10  }
  0x1f   : > { %s220_s1 = scalar_lea.hbm %s871_s2, %s507_s6  ;;  %s213_s19 = scalar_lea.vmem [#allocation6], %s500_s28 }
  0x20   : > { %s223_s23 = sshll.u32 %s213_s19, 4  ;;  %s221_s14 = sshll.u32 %s220_s1, 4  ;;  %s224_s23 = int_to_ptr.vmem [resolvable:$true] %s223_s23  ;;  %s222_s14 = int_to_ptr.hbm [resolvable:$true] %s221_s14 }
  0x21   : > { %530 = dma.hbm_to_vmem [thread:$0]  (!%p804_p9), %s222_s14, 256, %s224_s23, %s186_s8, %s728_s9, %s728_s9, %s729_s10  }
  0x22   : > { %235 = sbr.rel (%p816_p12) target bundleno = 247 (0xf7), region = 32  ;;  %s237_s24 = sand.u32 (!%p816_p12), 1, %s710_s13  }
  0x23   : > { %s512_s25 = smul.u32 (!%p816_p12), 48, %s237_s24  ;;  %s238_s26 = scalar_lea.sflag (!%p816_p12), [#allocation3], %s237_s24 }
  0x25   : > { %s241_s12 = scalar_lea.vmem (!%p816_p12), [#allocation2], %s512_s25 }
  0x27   : > { %697 = dma.done.wait (%p791_p7), %s238_s26, 768  }
  0x28   : > { %699 = vsyncadd (%p791_p7), %s238_s26, 4294966528  ;;  %s884_s1 = sadd.s32 4294967295, %s726_s17   ;;  %s251_s14 = scalar_lea.vmem [#allocation4], %s512_s25 }
  0x29   : > { %s247_s18 = sand.u32 1, %s884_s1  }
  0x2a   : > { %s248_s19 = scalar_lea.sflag [#allocation5], %s247_s18 }
  0x2b   : > { %701 = dma.done.wait (%p791_p7), %s248_s19, 1024  }
  0x2c   : > { %703 = vsyncadd (%p791_p7), %s248_s19, 4294966272  ;;  %s504_s23 = sshll.u32 %s237_s24, 4  ;;  %v305_v0 = vld [vmem:[%s241_s12] sm:$0xff]  ;;  %v306_v1 = vld [vmem:[%s241_s12 + $0x8] sm:$0xff]  ;;  %vm341_vm0 = vcmask 130048   ;;  %p299_p13 = scmp.lt.s32.totalorder %s718_s15, 1 }
  0x2d   : > { %v307_v2 = vld [vmem:[%s241_s12 + $0x10] sm:$0xff]  ;;  %v308_v3 = vld [vmem:[%s241_s12 + $0x18] sm:$0xff]  ;;  %v309_v4 = vld [vmem:[%s241_s12 + $0x20] sm:$0xff]  ;;  %s261_s27 = scalar_lea.vmem [#allocation6], %s504_s23  ;;  %vm363_vm1 = vcmask 0  }
  0x2e   : > { %v310_v5 = vld [vmem:[%s241_s12 + $0x28] sm:$0xff]  ;;  %v311_v6 = vld [vmem:[%s251_s14] sm:$0xff]  ;;  %v313_v8 = vld [vmem:[%s251_s14 + $0x10] sm:$0xff]  ;;  %s895_s15 = smov (!%p299_p13, %s718_s15), 1 }
  0x2f   : > { %v312_v7 = vld [vmem:[%s251_s14 + $0x8] sm:$0xff]  ;;  %v314_v9 = vld [vmem:[%s251_s14 + $0x18] sm:$0xff]  ;;  %v315_v10 = vld [vmem:[%s251_s14 + $0x20] sm:$0xff]  ;;  %v323_v12 = vsub.f32 %v305_v0, %v311_v6  ;;  %v325_v14 = vsub.f32 %v307_v2, %v313_v8  ;;  %s304_s9 = scalar_lea.vmem %s872_s3, %s895_s15 }
  0x30   : > { %v316_v11 = vld [vmem:[%s251_s14 + $0x28] sm:$0xff]  ;;  %v324_v13 = vsub.f32 %v306_v1, %v312_v7  ;;  %v317_v15 = vld [vmem:[%s261_s27] sm:$0xff]  ;;  %v326_v17 = vsub.f32 %v308_v3, %v314_v9  ;;  %v327_v18 = vsub.f32 %v309_v4, %v315_v10 }
  0x31   : > { %v318_v16 = vld [vmem:[%s261_s27 + $0x8] sm:$0xff]  ;;  %v328_v19 = vsub.f32 %v310_v5, %v316_v11  ;;  %v319_v20 = vmul.f32 -8.0, %v317_v15  ;;  %v329_v22 = vand.u32 2147483647, %v323_v12  ;;  %v331_v24 = vand.u32 2147483647, %v325_v14 }
  0x32   : > { %v320_v21 = vmul.f32 -8.0, %v318_v16  ;;  %v330_v23 = vand.u32 2147483647, %v324_v13  ;;  %v332_v25 = vand.u32 2147483647, %v326_v17 }
  0x33   : > { %v321_v26 = vadd.f32 10.0, %v319_v20  ;;  %v333_v28 = vand.u32 2147483647, %v327_v18  ;;  %v334_v29 = vand.u32 2147483647, %v328_v19 }
  0x34   : > { %v322_v27 = vadd.f32 10.0, %v320_v21 }
  0x35   : > { %v335_v30 = vmul.f32 %v329_v22, %v321_v26  ;;  %v337_v32 = vmul.f32 %v331_v24, %v321_v26  ;;  %v339_v34 = vmul.f32 %v333_v28, %v321_v26 }
  0x36   : > { %v336_v31 = vmul.f32 %v330_v23, %v322_v27  ;;  %v338_v33 = vmul.f32 %v332_v25, %v322_v27  ;;  %v340_v39 = vmul.f32 %v334_v29, %v322_v27 }
  0x37   : > { %v342_v35 = vsel %vm341_vm0, %v335_v30, 0.0  ;;  %v345_v37 = vsel %vm341_vm0, %v337_v32, 0.0  ;;  %v349_v42 = vsel %vm341_vm0, %v339_v34, 0.0 }
  0x38   : > { %v343_v36 = vsel %vm341_vm0, %v336_v31, 0.0  ;;  %v347_v40 = vsel %vm341_vm0, %v338_v33, 0.0  ;;  %v351_v44 = vsel %vm341_vm0, %v340_v39, 0.0 }
  0x39   : > { %v344_v38 = vadd.f32 %v343_v36, %v342_v35 }
  0x3b   : > { %v346_v41 = vadd.f32 %v345_v37, %v344_v38 }
  0x3d   : > { %v348_v43 = vadd.f32 %v347_v40, %v346_v41 }
  0x3f   : > { %v350_v45 = vadd.f32 %v349_v42, %v348_v43 }
  0x41   : > { %v352_v46 = vadd.f32 %v351_v44, %v350_v45 }
  0x43   : > { %353 = vadd.xlane.f32.xlu0 %v352_v46 }
  0xb6   : > { %v354_v47 = vpop.xlane.xlu0 %353 }
  0xb7   : > { %v355_v48 = vrot.slane %v354_v47, 4 }
  0xb9   : > { %v356_v49 = vadd.f32 %v355_v48, %v354_v47 }
  0xbb   : > { %v357_v50 = vrot.slane %v356_v49, 2 }
  0xbd   : > { %v358_v51 = vadd.f32 %v357_v50, %v356_v49 }
  0xbf   : > { %v359_v52 = vrot.slane %v358_v51, 1 }
  0xc1   : > { %v360_v53 = vadd.f32 %v359_v52, %v358_v51 }
  0xc3   : > { %513 = vpush %v360_v53 }
  0xf4   : > { %s514_s10 = spop %513 }
  0xf5   : > { %v362_v54 = vstv %s514_s10 }
  0xf6   : > { %364 = vst.msk [vmem:[%s304_s9] sm:$0x1] %vm363_vm1, %v362_v54 }
  0xf7 PF: > { %s19_s17 = sadd.s32 1, %s726_s17   ;;  %s885_s11 = sld [smem:[#allocation9_spill]] }
  0xf8   : > { %p16_p0 = scmp.ge.s32.totalorder %s19_s17, 4   ;;  %s886_s14 = sld [smem:[#allocation11_spill]] }
  0xf9   : > { %s887_s20 = sld [smem:[#allocation10_spill]]  ;;  %s888_s12 = smov %s710_s13 }
  0xfa   : > { %s890_s15 = smov %s722_s16 }
  0xfb   :  { %18 = sbr.rel (!%p16_p0) target bundleno = 8 (0x8), region = 96 }
  0xfd   : > { %s889_s13 = smov %s885_s11 }
  0xff   : > { %s891_s16 = smov %s887_s20 }
 0x100   :  { %388 = vsyncpa [#allocation3], 1 }
 0x101   :  { %390 = vsyncpa [#allocation3 + $0x1], 1 }
 0x102   :  { %391 = vsyncpa [#allocation5], 1 }
 0x103   :  { %393 = vsyncpa [#allocation5 + $0x1], 1 }

// kernel: text_removal_loss.9
= control target key start
LH: loop header
LB: loop body
LE: loop exit
PB: predicated region body
PF: predicated region fallthrough
CT: control target
= control target key end

     0   :  { %s478_s12 = smov 0   ;;  %s480_s13 = smov 0   ;;  %s522_s0 = inlined_call_operand.vmem [shape: f32[2,3,4,4], index: 0, kind: input, shape index: {}]   ;;  %s523_s1 = inlined_call_operand.vmem [shape: f32[2,3,4,4], index: 1, kind: input, shape index: {}]   ;;  %s524_s2 = inlined_call_operand.vmem [shape: f32[2,1,4,4], index: 2, kind: input, shape index: {}]   ;;  %s525_s3 = inlined_call_operand.vmem [shape: f32[2,1,1,1], index: 3, kind: output, shape index: {}]  }
   0x1   :  { %s482_s14 = smov 0  }
   0x2 LB: > { %s25_s15 = sadd.s32 1, %s452_s13  ;;  %p401_p0 = scmp.ge.s32.totalorder %s456_s14, 1  ;;  %s456_s14 = sphi %s482_s14, %s13_s14   ;;  %s452_s13 = sphi %s480_s13, %s527_s13   ;;  %s448_s12 = sphi %s478_s12, %s526_s12  }
   0x3   : > { %p27_p1 = scmp.ge.s32.totalorder %s25_s15, 2  ;;  %p185_p2 = scmp.lt.s32.totalorder %s456_s14, 3 }
   0x5   : > { %s529_s15 = smov (%p27_p1, %s25_s15), 0  ;;  %p186_p3 = pnand %p401_p0, %p185_p2 }
   0x6   : > { %p228_p4 = scmp.lt.s32.totalorder (!%p186_p3), %s448_s12, 1 }
   0x7   : > { %189 = sbr.rel (%p186_p3) target bundleno = 209 (0xd1), region = 32 }
   0xc   : > { %s531_s12 = smov (!%p228_p4, %s448_s12), 1  ;;  %vm275_vm0 = vcmask 27648   ;;  %vm291_vm1 = vcmask 0  }
   0xd   : > { %s407_s16 = smul.u32 12, %s531_s12  ;;  %s404_s17 = sshll.u32 %s531_s12, 2 }
   0xe   : > { %s250_s20 = scalar_lea.vmem %s524_s2, %s404_s17  ;;  %s256_s29 = scalar_lea.vmem %s525_s3, %s531_s12 }
   0xf   : > { %s235_s23 = scalar_lea.vmem %s522_s0, %s407_s16  ;;  %s243_s26 = scalar_lea.vmem %s523_s1, %s407_s16  ;;  %v263_v0 = vld [vmem:[%s250_s20] sm:$0xf] }
  0x10   : > { %v257_v1 = vld [vmem:[%s235_s23] sm:$0xf]  ;;  %v258_v2 = vld [vmem:[%s235_s23 + $0x4] sm:$0xf]  ;;  %v259_v3 = vld [vmem:[%s235_s23 + $0x8] sm:$0xf] }
  0x11   : > { %v260_v4 = vld [vmem:[%s243_s26] sm:$0xf]  ;;  %v261_v5 = vld [vmem:[%s243_s26 + $0x4] sm:$0xf]  ;;  %v262_v6 = vld [vmem:[%s243_s26 + $0x8] sm:$0xf] }
  0x12   : > { %v264_v7 = vmul.f32 -4.2, %v263_v0  ;;  %v266_v8 = vsub.f32 %v257_v1, %v260_v4  ;;  %v267_v9 = vsub.f32 %v258_v2, %v261_v5  ;;  %v268_v10 = vsub.f32 %v259_v3, %v262_v6 }
  0x14   : > { %v265_v11 = vadd.f32 5.0, %v264_v7  ;;  %v269_v12 = vand.u32 2147483647, %v266_v8  ;;  %v270_v13 = vand.u32 2147483647, %v267_v9 }
  0x15   : > { %v271_v14 = vand.u32 2147483647, %v268_v10 }
  0x16   : > { %v272_v15 = vmul.f32 %v269_v12, %v265_v11  ;;  %v273_v16 = vmul.f32 %v270_v13, %v265_v11 }
  0x17   : > { %v274_v17 = vmul.f32 %v271_v14, %v265_v11 }
  0x18   : > { %v276_v18 = vsel %vm275_vm0, %v272_v15, 0.0  ;;  %v277_v19 = vsel %vm275_vm0, %v273_v16, 0.0 }
  0x19   : > { %v278_v20 = vadd.f32 %v277_v19, %v276_v18  ;;  %v279_v21 = vsel %vm275_vm0, %v274_v17, 0.0 }
  0x1b   : > { %v280_v22 = vadd.f32 %v279_v21, %v278_v20 }
  0x1d   : > { %281 = vadd.xlane.f32.xlu0 %v280_v22 }
  0x90   : > { %v282_v23 = vpop.xlane.xlu0 %281 }
  0x91   : > { %v283_v24 = vrot.slane %v282_v23, 4 }
  0x93   : > { %v284_v25 = vadd.f32 %v283_v24, %v282_v23 }
  0x95   : > { %v285_v26 = vrot.slane %v284_v25, 2 }
  0x97   : > { %v286_v27 = vadd.f32 %v285_v26, %v284_v25 }
  0x99   : > { %v287_v28 = vrot.slane %v286_v27, 1 }
  0x9b   : > { %v288_v29 = vadd.f32 %v287_v28, %v286_v27 }
  0x9d   : > { %408 = vpush %v288_v29 }
  0xce   : > { %s409_s30 = spop %408 }
  0xcf   : > { %v290_v30 = vstv %s409_s30 }
  0xd0   : > { %292 = vst.msk [vmem:[%s256_s29] sm:$0x1] %vm291_vm1, %v290_v30 }
  0xd1 PF: > { %s13_s14 = sadd.s32 1, %s456_s14   ;;  %s526_s12 = smov %s452_s13 }
  0xd2   : > { %p10_p5 = scmp.ge.s32.totalorder %s13_s14, 4   ;;  %s527_s13 = smov %s529_s15 }
  0xd4   :  { %12 = sbr.rel (!%p10_p5) target bundleno = 2 (0x2), region = 68 }

// kernel: text_removal_loss.6
= control target key start
LH: loop header
LB: loop body
LE: loop exit
PB: predicated region body
PF: predicated region fallthrough
CT: control target
= control target key end

     0   :  { %s744_s15 = smov 0   ;;  %s746_s16 = smov 0   ;;  %s807_s0 = inlined_call_operand.vmem [shape: f32[2,8,256], index: 0, kind: input, shape index: {}]   ;;  %s808_s1 = inlined_call_operand.vmem [shape: f32[2,8,256], index: 1, kind: input, shape index: {}]   ;;  %s809_s2 = inlined_call_operand.vmem [shape: f32[2,8,256], index: 2, kind: input, shape index: {}]   ;;  %s810_s3 = inlined_call_operand.vmem [shape: f32[2,1,1], index: 3, kind: output, shape index: {0}]   ;;  %s811_s4 = inlined_call_operand.vmem [shape: f32[2,1,1], index: 4, kind: output, shape index: {1}]  }
   0x1   :  { %s748_s17 = smov 0  }
   0x2 LB: > { %s27_s18 = sadd.s32 1, %s712_s16  ;;  %p649_p0 = scmp.ge.s32.totalorder %s716_s17, 1  ;;  %s716_s17 = sphi %s748_s17, %s15_s17   ;;  %s712_s16 = sphi %s746_s16, %s813_s16   ;;  %s708_s15 = sphi %s744_s15, %s812_s15  }
   0x3   : > { %p29_p1 = scmp.ge.s32.totalorder %s27_s18, 2  ;;  %p218_p2 = scmp.lt.s32.totalorder %s716_s17, 3 }
   0x5   : > { %s815_s18 = smov (%p29_p1, %s27_s18), 0  ;;  %p219_p3 = pnand %p649_p0, %p218_p2 }
   0x6   : > { %p268_p4 = scmp.lt.s32.totalorder (!%p219_p3), %s708_s15, 1 }
   0x7   : > { %222 = sbr.rel (%p219_p3) target bundleno = 365 (0x16d), region = 32 }
   0xc   : > { %s817_s15 = smov (!%p268_p4, %s708_s15), 1  ;;  %vm309_vm0 = vcmask 64512   ;;  %v718_v6 = vmov 0.0   ;;  %vm307_vm1 = vcmask 0  }
   0xd   : > { %s658_s19 = sshll.u32 %s817_s15, 4  ;;  %310 = vst.msk [vmem:[#allocation3] sm:$0xff] %vm309_vm0, %v718_v6  ;;  %s299_s8 = scalar_lea.vmem %s810_s3, %s817_s15 }
   0xe   : > { %s275_s22 = scalar_lea.vmem %s807_s0, %s658_s19  ;;  %s285_s25 = scalar_lea.vmem %s808_s1, %s658_s19  ;;  %311 = vst.msk [vmem:[#allocation4] sm:$0xff] %vm309_vm0, %v718_v6 }
   0xf   : > { %v313_v0 = vld [vmem:[%s275_s22] sm:$0xff]  ;;  %v314_v1 = vld [vmem:[%s275_s22 + $0x8] sm:$0xff]  ;;  %s295_s28 = scalar_lea.vmem %s809_s2, %s658_s19  ;;  %312 = vst.msk [vmem:[#allocation5] sm:$0xff] %vm309_vm0, %v718_v6  ;;  %s302_s14 = scalar_lea.vmem %s811_s4, %s817_s15 }
  0x10   : > { %v315_v2 = vld [vmem:[%s285_s25] sm:$0xff]  ;;  %369 = vmatpush.xpose.msra.mxu0 %v313_v0  ;;  %389 = vmatpush.xpose.msra.mxu1 %v314_v1  ;;  %v316_v3 = vld [vmem:[%s285_s25 + $0x8] sm:$0xff]  ;;  %308 = vst.msk [vmem:[#allocation2] sm:$0x1] %vm307_vm1, %v718_v6 }
  0x11   : > { %v317_v4 = vld [vmem:[%s295_s28] sm:$0xff]  ;;  %v318_v5 = vld [vmem:[%s295_s28 + $0x8] sm:$0xff]  ;;  %413 = vmatpush.xpose.msra.mxu2 %v315_v2  ;;  %433 = vmatpush.xpose.msra.mxu3 %v316_v3 }
  0x12   : > { %v320_v7 = vsub.f32 %v313_v0, %v317_v4  ;;  %v321_v8 = vsub.f32 %v314_v1, %v318_v5  ;;  %v334_v12 = vsub.f32 %v315_v2, %v317_v4  ;;  %v335_v13 = vsub.f32 %v316_v3, %v318_v5 }
  0x13   : > { %370 = vmatmul.f32.vlgmr.msra.gmra.mxu0 %v313_v0  ;;  %390 = vmatmul.f32.vlgmr.msra.gmra.mxu1 %v314_v1 }
  0x14   : > { %456 = vmatpush.xpose.msrb.mxu0 %v317_v4  ;;  %476 = vmatpush.xpose.msrb.mxu1 %v318_v5  ;;  %v322_v9 = vand.u32 2147483647, %v320_v7  ;;  %v323_v10 = vand.u32 2147483647, %v321_v8  ;;  %v336_v14 = vand.u32 2147483647, %v334_v12 }
  0x15   : > { %414 = vmatmul.f32.vlgmr.msra.gmra.mxu2 %v315_v2  ;;  %434 = vmatmul.f32.vlgmr.msra.gmra.mxu3 %v316_v3  ;;  %v337_v15 = vand.u32 2147483647, %v335_v13  ;;  %v353_v18 = vld [vmem:[#allocation3] sm:$0xff]  ;;  %v397_v23 = vld [vmem:[#allocation4] sm:$0xff] }
  0x16   : > { %v324_v11 = vadd.f32 %v323_v10, %v322_v9  ;;  %v440_v27 = vld [vmem:[#allocation5] sm:$0xff] }
  0x17   : > { %v338_v16 = vadd.f32 %v337_v15, %v336_v14  ;;  %v319_v7 = vld [vmem:[#allocation2] sm:$0x1] }
  0x18   : > { %325 = vadd.xlane.f32.xlu0 %v324_v11 }
  0x1b   : > { %457 = vmatmul.f32.vlgmr.msrb.gmra.mxu0 %v317_v4  ;;  %477 = vmatmul.f32.vlgmr.msrb.gmra.mxu1 %v318_v5 }
  0x20   : > { %339 = vadd.xlane.f32.xlu0 %v338_v16 }
  0x8b   : > { %v326_v44 = vpop.xlane.xlu0 %325 }
  0x8c   : > { %v327_v45 = vrot.slane %v326_v44, 4 }
  0x8e   : > { %v328_v46 = vadd.f32 %v327_v45, %v326_v44 }
  0x90   : > { %v371_v17 = vpop.f32.mrf.mxu0  ;;  %v391_v19 = vpop.f32.mrf.mxu1  ;;  %v329_v47 = vrot.slane %v328_v46, 2 }
  0x91   : > { %v392_v20 = vadd.f32 %v391_v19, %v371_v17 }
  0x92   : > { %v330_v48 = vadd.f32 %v329_v47, %v328_v46 }
  0x93   : > { %v394_v21 = vadd.f32 %v392_v20, %v353_v18  ;;  %v340_v49 = vpop.xlane.xlu0 %339 }
  0x94   : > { %v341_v50 = vrot.slane %v340_v49, 4  ;;  %v331_v51 = vrot.slane %v330_v48, 1 }
  0x95   : > { %396 = vst.msk [vmem:[#allocation3] sm:$0xff] %vm309_vm0, %v394_v21 }
  0x96   : > { %v342_v52 = vadd.f32 %v341_v50, %v340_v49  ;;  %v332_v53 = vadd.f32 %v331_v51, %v330_v48 }
  0x98   : > { %v415_v22 = vpop.f32.mrf.mxu2  ;;  %v435_v24 = vpop.f32.mrf.mxu3  ;;  %v343_v54 = vrot.slane %v342_v52, 2  ;;  %661 = vpush %v332_v53 }
  0x99   : > { %v436_v25 = vadd.f32 %v435_v24, %v415_v22  ;;  %v458_v26 = vpop.f32.mrf.mxu0  ;;  %v478_v28 = vpop.f32.mrf.mxu1 }
  0x9a   : > { %v479_v29 = vadd.f32 %v478_v28, %v458_v26  ;;  %v344_v55 = vadd.f32 %v343_v54, %v342_v52 }
  0x9b   : > { %v438_v30 = vadd.f32 %v436_v25, %v397_v23 }
  0x9c   : > { %v481_v31 = vadd.f32 %v479_v29, %v440_v27  ;;  %v486_v32 = vld [vmem:[#allocation3] sm:$0xff]  ;;  %v345_v56 = vrot.slane %v344_v55, 1 }
  0x9d   : > { %439 = vst.msk [vmem:[#allocation4] sm:$0xff] %vm309_vm0, %v438_v30  ;;  %v487_v35 = vmul.f32 0.00048828125, %v486_v32 }
  0x9e   : > { %482 = vst.msk [vmem:[#allocation5] sm:$0xff] %vm309_vm0, %v481_v31  ;;  %v346_v57 = vadd.f32 %v345_v56, %v344_v55 }
  0xa0   : > { %663 = vpush %v346_v57 }
  0xa4   : > { %v488_v34 = vld [vmem:[#allocation4] sm:$0xff] }
  0xa5   : > { %v490_v33 = vld [vmem:[#allocation5] sm:$0xff]  ;;  %v489_v38 = vmul.f32 0.00048828125, %v488_v34 }
  0xa6   : > { %v491_v36 = vmul.f32 0.00048828125, %v490_v33 }
  0xa8   : > { %v492_v37 = vsub.f32 %v487_v35, %v491_v36  ;;  %v504_v41 = vsub.f32 %v489_v38, %v491_v36 }
  0xaa   : > { %v493_v39 = vand.u32 2147483647, %v492_v37  ;;  %v505_v42 = vand.u32 2147483647, %v504_v41 }
  0xac   : > { %v494_v40 = vsel %vm309_vm0, %v493_v39, 0.0  ;;  %v506_v43 = vsel %vm309_vm0, %v505_v42, 0.0 }
  0xad   : > { %495 = vadd.xlane.f32.xlu1 %v494_v40 }
  0xb5   : > { %507 = vadd.xlane.f32.xlu1 %v506_v43 }
  0xc9   : > { %s662_s29 = spop %661 }
  0xd1   : > { %s664_s30 = spop %663 }
  0xd2   : > { %s348_s5 = sadd.f32 %s664_s30, %s662_s29 }
  0xd4   : > { %v349_v8 = vstv %s348_s5 }
  0xd5   : > { %v350_v9 = vadd.f32 %v349_v8, %v319_v7 }
  0xd7   : > { %352 = vst.msk [vmem:[#allocation2] sm:$0x1] %vm307_vm1, %v350_v9 }
  0xde   : > { %v518_v11 = vld [vmem:[#allocation2] sm:$0x1] }
  0xdf   : > { %v519_v12 = vmul.f32 0.00024414063, %v518_v11 }
  0xe1   : > { %520 = vst.msk [vmem:[%s299_s8] sm:$0x1] %vm307_vm1, %v519_v12 }
 0x120   : > { %v496_v58 = vpop.xlane.xlu1 %495 }
 0x121   : > { %v497_v59 = vrot.slane %v496_v58, 4 }
 0x123   : > { %v498_v60 = vadd.f32 %v497_v59, %v496_v58 }
 0x125   : > { %v499_v61 = vrot.slane %v498_v60, 2 }
 0x127   : > { %v500_v62 = vadd.f32 %v499_v61, %v498_v60 }
 0x128   : > { %v508_v63 = vpop.xlane.xlu1 %507 }
 0x129   : > { %v509_v0 = vrot.slane %v508_v63, 4  ;;  %v501_v1 = vrot.slane %v500_v62, 1 }
 0x12b   : > { %v510_v2 = vadd.f32 %v509_v0, %v508_v63  ;;  %v502_v3 = vadd.f32 %v501_v1, %v500_v62 }
 0x12d   : > { %v511_v4 = vrot.slane %v510_v2, 2  ;;  %665 = vpush %v502_v3 }
 0x12f   : > { %v512_v5 = vadd.f32 %v511_v4, %v510_v2 }
 0x131   : > { %v513_v6 = vrot.slane %v512_v5, 1 }
 0x133   : > { %v514_v10 = vadd.f32 %v513_v6, %v512_v5 }
 0x135   : > { %667 = vpush %v514_v10 }
 0x15e   : > { %s666_s9 = spop %665 }
 0x166   : > { %s668_s10 = spop %667 }
 0x167   : > { %s516_s11 = sadd.f32 %s668_s10, %s666_s9 }
 0x169   : > { %s517_s19 = smul.f32 0.0078125, %s516_s11 }
 0x16b   : > { %v521_v13 = vstv %s517_s19 }
 0x16c   : > { %522 = vst.msk [vmem:[%s302_s14] sm:$0x1] %vm307_vm1, %v521_v13 }
 0x16d PF: > { %s15_s17 = sadd.s32 1, %s716_s17   ;;  %s812_s15 = smov %s712_s16 }
 0x16e   : > { %p12_p5 = scmp.ge.s32.totalorder %s15_s17, 4   ;;  %s813_s16 = smov %s815_s18 }
 0x170   :  { %14 = sbr.rel (!%p12_p5) target bundleno = 2 (0x2), region = 88 }

// kernel: text_removal_loss.10
= control target key start
LH: loop header
LB: loop body
LE: loop exit
PB: predicated region body
PF: predicated region fallthrough
CT: control target
= control target key end

     0   :  { %s478_s12 = smov 0   ;;  %s480_s13 = smov 0   ;;  %s522_s0 = inlined_call_operand.vmem [shape: f32[2,3,8,8], index: 0, kind: input, shape index: {}]   ;;  %s523_s1 = inlined_call_operand.vmem [shape: f32[2,3,8,8], index: 1, kind: input, shape index: {}]   ;;  %s524_s2 = inlined_call_operand.vmem [shape: f32[2,1,8,8], index: 2, kind: input, shape index: {}]   ;;  %s525_s3 = inlined_call_operand.vmem [shape: f32[2,1,1,1], index: 3, kind: output, shape index: {}]  }
   0x1   :  { %s482_s14 = smov 0  }
   0x2 LB: > { %s25_s15 = sadd.s32 1, %s452_s13  ;;  %p401_p0 = scmp.ge.s32.totalorder %s456_s14, 1  ;;  %s456_s14 = sphi %s482_s14, %s13_s14   ;;  %s452_s13 = sphi %s480_s13, %s527_s13   ;;  %s448_s12 = sphi %s478_s12, %s526_s12  }
   0x3   : > { %p27_p1 = scmp.ge.s32.totalorder %s25_s15, 2  ;;  %p185_p2 = scmp.lt.s32.totalorder %s456_s14, 3 }
   0x5   : > { %s529_s15 = smov (%p27_p1, %s25_s15), 0  ;;  %p186_p3 = pnand %p401_p0, %p185_p2 }
   0x6   : > { %p228_p4 = scmp.lt.s32.totalorder (!%p186_p3), %s448_s12, 1 }
   0x7   : > { %189 = sbr.rel (%p186_p3) target bundleno = 209 (0xd1), region = 32 }
   0xc   : > { %s531_s12 = smov (!%p228_p4, %s448_s12), 1  ;;  %vm275_vm0 = vcmask 64512   ;;  %vm291_vm1 = vcmask 0  }
   0xd   : > { %s407_s16 = smul.u32 24, %s531_s12  ;;  %s404_s17 = sshll.u32 %s531_s12, 3 }
   0xe   : > { %s250_s20 = scalar_lea.vmem %s524_s2, %s404_s17  ;;  %s256_s29 = scalar_lea.vmem %s525_s3, %s531_s12 }
   0xf   : > { %s235_s23 = scalar_lea.vmem %s522_s0, %s407_s16  ;;  %s243_s26 = scalar_lea.vmem %s523_s1, %s407_s16  ;;  %v263_v0 = vld [vmem:[%s250_s20] sm:$0xff] }
  0x10   : > { %v257_v1 = vld [vmem:[%s235_s23] sm:$0xff]  ;;  %v258_v2 = vld [vmem:[%s235_s23 + $0x8] sm:$0xff]  ;;  %v259_v3 = vld [vmem:[%s235_s23 + $0x10] sm:$0xff]  ;;  %v264_v4 = vmul.f32 -5.0, %v263_v0 }
  0x11   : > { %v260_v5 = vld [vmem:[%s243_s26] sm:$0xff]  ;;  %v261_v6 = vld [vmem:[%s243_s26 + $0x8] sm:$0xff]  ;;  %v262_v7 = vld [vmem:[%s243_s26 + $0x10] sm:$0xff] }
  0x12   : > { %v265_v8 = vadd.f32 6.0, %v264_v4  ;;  %v266_v9 = vsub.f32 %v257_v1, %v260_v5  ;;  %v267_v10 = vsub.f32 %v258_v2, %v261_v6  ;;  %v268_v11 = vsub.f32 %v259_v3, %v262_v7 }
  0x14   : > { %v269_v12 = vand.u32 2147483647, %v266_v9  ;;  %v270_v13 = vand.u32 2147483647, %v267_v10  ;;  %v271_v14 = vand.u32 2147483647, %v268_v11 }
  0x16   : > { %v272_v15 = vmul.f32 %v269_v12, %v265_v8  ;;  %v273_v16 = vmul.f32 %v270_v13, %v265_v8  ;;  %v274_v17 = vmul.f32 %v271_v14, %v265_v8 }
  0x18   : > { %v276_v18 = vsel %vm275_vm0, %v272_v15, 0.0  ;;  %v277_v19 = vsel %vm275_vm0, %v273_v16, 0.0  ;;  %v279_v20 = vsel %vm275_vm0, %v274_v17, 0.0 }
  0x19   : > { %v278_v21 = vadd.f32 %v277_v19, %v276_v18 }
  0x1b   : > { %v280_v22 = vadd.f32 %v279_v20, %v278_v21 }
  0x1d   : > { %281 = vadd.xlane.f32.xlu0 %v280_v22 }
  0x90   : > { %v282_v23 = vpop.xlane.xlu0 %281 }
  0x91   : > { %v283_v24 = vrot.slane %v282_v23, 4 }
  0x93   : > { %v284_v25 = vadd.f32 %v283_v24, %v282_v23 }
  0x95   : > { %v285_v26 = vrot.slane %v284_v25, 2 }
  0x97   : > { %v286_v27 = vadd.f32 %v285_v26, %v284_v25 }
  0x99   : > { %v287_v28 = vrot.slane %v286_v27, 1 }
  0x9b   : > { %v288_v29 = vadd.f32 %v287_v28, %v286_v27 }
  0x9d   : > { %408 = vpush %v288_v29 }
  0xce   : > { %s409_s30 = spop %408 }
  0xcf   : > { %v290_v30 = vstv %s409_s30 }
  0xd0   : > { %292 = vst.msk [vmem:[%s256_s29] sm:$0x1] %vm291_vm1, %v290_v30 }
  0xd1 PF: > { %s13_s14 = sadd.s32 1, %s456_s14   ;;  %s526_s12 = smov %s452_s13 }
  0xd2   : > { %p10_p5 = scmp.ge.s32.totalorder %s13_s14, 4   ;;  %s527_s13 = smov %s529_s15 }
  0xd4   :  { %12 = sbr.rel (!%p10_p5) target bundleno = 2 (0x2), region = 68 }

// kernel: text_removal_loss.7
= control target key start
LH: loop header
LB: loop body
LE: loop exit
PB: predicated region body
PF: predicated region fallthrough
CT: control target
= control target key end

     0   :  { %s741_s15 = smov 0   ;;  %s743_s16 = smov 0   ;;  %s833_s0 = inlined_call_operand.vmem [shape: f32[2,16,64], index: 0, kind: input, shape index: {}]   ;;  %s834_s1 = inlined_call_operand.vmem [shape: f32[2,16,64], index: 1, kind: input, shape index: {}]   ;;  %s835_s2 = inlined_call_operand.vmem [shape: f32[2,16,64], index: 2, kind: input, shape index: {}]   ;;  %s836_s3 = inlined_call_operand.vmem [shape: f32[2,1,1], index: 3, kind: output, shape index: {0}]   ;;  %s837_s4 = inlined_call_operand.vmem [shape: f32[2,1,1], index: 4, kind: output, shape index: {1}]  }
   0x1   :  { %s745_s17 = smov 0  }
   0x2 LB: > { %s27_s18 = sadd.s32 1, %s709_s16  ;;  %p632_p0 = scmp.ge.s32.totalorder %s713_s17, 1  ;;  %s713_s17 = sphi %s745_s17, %s15_s17   ;;  %s709_s16 = sphi %s743_s16, %s839_s16   ;;  %s705_s15 = sphi %s741_s15, %s838_s15  }
   0x3   : > { %p29_p1 = scmp.ge.s32.totalorder %s27_s18, 2  ;;  %p212_p2 = scmp.lt.s32.totalorder %s713_s17, 3 }
   0x5   : > { %s841_s18 = smov (%p29_p1, %s27_s18), 0  ;;  %p213_p3 = pnand %p632_p0, %p212_p2 }
   0x6   : > { %p258_p4 = scmp.lt.s32.totalorder (!%p213_p3), %s705_s15, 1 }
   0x7   : > { %216 = sbr.rel (%p213_p3) target bundleno = 374 (0x176), region = 32 }
   0xc   : > { %vm294_vm0 = vcmask 130048   ;;  %v715_v0 = vmov 0.0   ;;  %s843_s15 = smov (!%p258_p4, %s705_s15), 1  ;;  %vm312_vm1 = vcmask 523264   ;;  %vm292_vm2 = vcmask 0  }
   0xd   : > { %295 = vst.msk [vmem:[#allocation3] sm:$0xff] %vm294_vm0, %v715_v0  ;;  %s653_s19 = sshll.u32 %s843_s15, 4  ;;  %s284_s8 = scalar_lea.vmem %s836_s3, %s843_s15 }
   0xe   : > { %296 = vst.msk [vmem:[#allocation3 + $0x8] sm:$0xff] %vm294_vm0, %v715_v0  ;;  %s281_s22 = scalar_lea.vmem %s835_s2, %s653_s19  ;;  %s265_s25 = scalar_lea.vmem %s833_s0, %s653_s19 }
   0xf   : > { %297 = vst.msk [vmem:[#allocation4] sm:$0xff] %vm294_vm0, %v715_v0  ;;  %v306_v1 = vld [vmem:[%s281_s22 + $0x8] sm:$0xff]  ;;  %s273_s28 = scalar_lea.vmem %s834_s1, %s653_s19  ;;  %v305_v4 = vld [vmem:[%s281_s22] sm:$0xff]  ;;  %s287_s14 = scalar_lea.vmem %s837_s4, %s843_s15 }
  0x10   : > { %298 = vst.msk [vmem:[#allocation4 + $0x8] sm:$0xff] %vm294_vm0, %v715_v0  ;;  %v302_v2 = vld [vmem:[%s265_s25 + $0x8] sm:$0xff]  ;;  %647 = vmatpush.xpose.msk.msra.mxu2 %vm312_vm1, %v306_v1  ;;  %v301_v5 = vld [vmem:[%s265_s25] sm:$0xff] }
  0x11   : > { %299 = vst.msk [vmem:[#allocation5] sm:$0xff] %vm294_vm0, %v715_v0  ;;  %639 = vmatpush.xpose.msk.msra.mxu0 %vm312_vm1, %v302_v2  ;;  %v304_v3 = vld [vmem:[%s273_s28 + $0x8] sm:$0xff]  ;;  %656 = vmatpush.xpose.msk.msra.mxu3 %vm312_vm1, %v302_v2  ;;  %v303_v6 = vld [vmem:[%s273_s28] sm:$0xff]  ;;  %v308_v7 = vsub.f32 %v301_v5, %v305_v4  ;;  %v309_v8 = vsub.f32 %v302_v2, %v306_v1 }
  0x12   : > { %300 = vst.msk [vmem:[#allocation5 + $0x8] sm:$0xff] %vm294_vm0, %v715_v0  ;;  %643 = vmatpush.xpose.msk.msra.mxu1 %vm312_vm1, %v304_v3  ;;  %v326_v14 = vsub.f32 %v304_v3, %v306_v1  ;;  %v325_v15 = vsub.f32 %v303_v6, %v305_v4 }
  0x13   : > { %v310_v9 = vand.u32 2147483647, %v308_v7  ;;  %v311_v10 = vand.u32 2147483647, %v309_v8  ;;  %293 = vst.msk [vmem:[#allocation2] sm:$0x1] %vm292_vm2, %v715_v0 }
  0x14   : > { %648 = vmatpush.xpose.msk.msra.mxu2 %vm312_vm1, %v305_v4  ;;  %v327_v16 = vand.u32 2147483647, %v325_v15  ;;  %v328_v17 = vand.u32 2147483647, %v326_v14  ;;  %v346_v21 = vld [vmem:[#allocation3] sm:$0xff] }
  0x15   : > { %640 = vmatpush.xpose.msk.msra.mxu0 %vm312_vm1, %v301_v5  ;;  %657 = vmatpush.xpose.msk.msra.mxu3 %vm312_vm1, %v301_v5  ;;  %v313_v11 = vsel %vm312_vm1, %v310_v9, 0.0  ;;  %v314_v12 = vsel %vm312_vm1, %v311_v10, 0.0  ;;  %v347_v28 = vld [vmem:[#allocation3 + $0x8] sm:$0xff] }
  0x16   : > { %644 = vmatpush.xpose.msk.msra.mxu1 %vm312_vm1, %v303_v6  ;;  %v315_v13 = vadd.f32 %v314_v12, %v313_v11  ;;  %v329_v18 = vsel %vm312_vm1, %v327_v16, 0.0  ;;  %v330_v19 = vsel %vm312_vm1, %v328_v17, 0.0  ;;  %v382_v22 = vld [vmem:[#allocation4] sm:$0xff] }
  0x17   : > { %649 = vmatmul.msk.f32.vlgmr.msra.gmra.mxu2 %vm312_vm1, %v305_v4  ;;  %v331_v20 = vadd.f32 %v330_v19, %v329_v18  ;;  %v383_v32 = vld [vmem:[#allocation4 + $0x8] sm:$0xff] }
  0x18   : > { %641 = vmatmul.msk.f32.vlgmr.msra.gmra.mxu0 %vm312_vm1, %v301_v5  ;;  %642 = vmatmul.msk.f32.vlgmr.msra.gmra.mxu3 %vm312_vm1, %v302_v2  ;;  %v417_v27 = vld [vmem:[#allocation5] sm:$0xff] }
  0x19   : > { %645 = vmatmul.msk.f32.vlgmr.msra.gmra.mxu1 %vm312_vm1, %v303_v6  ;;  %316 = vadd.xlane.f32.xlu0 %v315_v13  ;;  %v418_v36 = vld [vmem:[#allocation5 + $0x8] sm:$0xff] }
  0x1f   : > { %650 = vmatmul.msk.f32.gmra.mxu2 %vm312_vm1, %v306_v1 }
  0x21   : > { %646 = vmatmul.msk.f32.gmra.mxu1 %vm312_vm1, %v304_v3  ;;  %332 = vadd.xlane.f32.xlu0 %v331_v20 }
  0x8c   : > { %v317_v2 = vpop.xlane.xlu0 %316 }
  0x8d   : > { %v318_v3 = vrot.slane %v317_v2, 4 }
  0x8f   : > { %v319_v4 = vadd.f32 %v318_v3, %v317_v2 }
  0x91   : > { %v320_v5 = vrot.slane %v319_v4, 2 }
  0x93   : > { %v321_v6 = vadd.f32 %v320_v5, %v319_v4 }
  0x94   : > { %v333_v7 = vpop.xlane.xlu0 %332 }
  0x95   : > { %v371_v23 = vpop.f32.mrf.mxu0  ;;  %v334_v8 = vrot.slane %v333_v7, 4  ;;  %v322_v9 = vrot.slane %v321_v6, 1 }
  0x96   : > { %v377_v24 = vadd.f32 %v371_v23, %v346_v21  ;;  %v407_v25 = vpop.f32.mrf.mxu1 }
  0x97   : > { %v413_v26 = vadd.f32 %v407_v25, %v382_v22  ;;  %v335_v10 = vadd.f32 %v334_v8, %v333_v7  ;;  %v323_v11 = vadd.f32 %v322_v9, %v321_v6 }
  0x98   : > { %380 = vst.msk [vmem:[#allocation3] sm:$0xff] %vm294_vm0, %v377_v24 }
  0x99   : > { %415 = vst.msk [vmem:[#allocation4] sm:$0xff] %vm294_vm0, %v413_v26  ;;  %v336_v12 = vrot.slane %v335_v10, 2 }
  0x9a   : > { %v442_v29 = vpop.f32.mrf.mxu2  ;;  %658 = vpush %v323_v11 }
  0x9b   : > { %v448_v30 = vadd.f32 %v442_v29, %v417_v27  ;;  %v374_v31 = vpop.f32.mrf.mxu3  ;;  %v337_v13 = vadd.f32 %v336_v12, %v335_v10 }
  0x9c   : > { %v378_v33 = vadd.f32 %v374_v31, %v347_v28  ;;  %v307_v28 = vld [vmem:[#allocation2] sm:$0x1] }
  0x9d   : > { %450 = vst.msk [vmem:[#allocation5] sm:$0xff] %vm294_vm0, %v448_v30  ;;  %v338_v14 = vrot.slane %v337_v13, 1 }
  0x9e   : > { %v410_v34 = vpop.f32.mrf.mxu1  ;;  %381 = vst.msk [vmem:[#allocation3 + $0x8] sm:$0xff] %vm294_vm0, %v378_v33 }
  0x9f   : > { %v414_v35 = vadd.f32 %v410_v34, %v383_v32  ;;  %v455_v39 = vld [vmem:[#allocation3] sm:$0xff]  ;;  %v339_v15 = vadd.f32 %v338_v14, %v337_v13 }
  0xa0   : > { %v457_v41 = vmul.f32 0.0009765625, %v455_v39  ;;  %v459_v48 = vld [vmem:[#allocation4] sm:$0xff] }
  0xa1   : > { %416 = vst.msk [vmem:[#allocation4 + $0x8] sm:$0xff] %vm294_vm0, %v414_v35  ;;  %v461_v53 = vmul.f32 0.0009765625, %v459_v48 }
  0xa2   : > { %v445_v37 = vpop.f32.mrf.mxu2  ;;  %660 = vpush %v339_v15 }
  0xa3   : > { %v449_v38 = vadd.f32 %v445_v37, %v418_v36 }
  0xa4   : > { %v463_v40 = vld [vmem:[#allocation5] sm:$0xff] }
  0xa5   : > { %451 = vst.msk [vmem:[#allocation5 + $0x8] sm:$0xff] %vm294_vm0, %v449_v38  ;;  %v465_v42 = vmul.f32 0.0009765625, %v463_v40  ;;  %v456_v43 = vld [vmem:[#allocation3 + $0x8] sm:$0xff] }
  0xa6   : > { %v458_v45 = vmul.f32 0.0009765625, %v456_v43 }
  0xa7   : > { %v467_v46 = vsub.f32 %v457_v41, %v465_v42  ;;  %v483_v58 = vsub.f32 %v461_v53, %v465_v42 }
  0xa8   : > { %v460_v44 = vld [vmem:[#allocation4 + $0x8] sm:$0xff] }
  0xa9   : > { %v462_v50 = vmul.f32 0.0009765625, %v460_v44  ;;  %v469_v52 = vand.u32 2147483647, %v467_v46  ;;  %v485_v61 = vand.u32 2147483647, %v483_v58 }
  0xab   : > { %v471_v56 = vsel %vm294_vm0, %v469_v52, 0.0  ;;  %v487_v63 = vsel %vm294_vm0, %v485_v61, 0.0 }
  0xac   : > { %v464_v47 = vld [vmem:[#allocation5 + $0x8] sm:$0xff] }
  0xad   : > { %v466_v49 = vmul.f32 0.0009765625, %v464_v47 }
  0xaf   : > { %v468_v51 = vsub.f32 %v458_v45, %v466_v49  ;;  %v484_v55 = vsub.f32 %v462_v50, %v466_v49 }
  0xb1   : > { %v470_v54 = vand.u32 2147483647, %v468_v51  ;;  %v486_v60 = vand.u32 2147483647, %v484_v55 }
  0xb3   : > { %v472_v57 = vsel %vm294_vm0, %v470_v54, 0.0  ;;  %v488_v62 = vsel %vm294_vm0, %v486_v60, 0.0 }
  0xb4   : > { %v473_v59 = vadd.f32 %v472_v57, %v471_v56  ;;  %v489_v1 = vadd.f32 %v488_v62, %v487_v63 }
  0xb6   : > { %474 = vadd.xlane.f32.xlu1 %v473_v59 }
  0xbe   : > { %490 = vadd.xlane.f32.xlu1 %v489_v1 }
  0xcb   : > { %s659_s29 = spop %658 }
  0xd3   : > { %s661_s30 = spop %660 }
  0xd4   : > { %s341_s5 = sadd.f32 %s661_s30, %s659_s29 }
  0xd6   : > { %v342_v29 = vstv %s341_s5 }
  0xd7   : > { %v343_v30 = vadd.f32 %v342_v29, %v307_v28 }
  0xd9   : > { %345 = vst.msk [vmem:[#allocation2] sm:$0x1] %vm292_vm2, %v343_v30 }
  0xe0   : > { %v501_v32 = vld [vmem:[#allocation2] sm:$0x1] }
  0xe1   : > { %v502_v33 = vmul.f32 0.00048828125, %v501_v32 }
  0xe3   : > { %503 = vst.msk [vmem:[%s284_s8] sm:$0x1] %vm292_vm2, %v502_v33 }
 0x129   : > { %v475_v16 = vpop.xlane.xlu1 %474 }
 0x12a   : > { %v476_v17 = vrot.slane %v475_v16, 4 }
 0x12c   : > { %v477_v18 = vadd.f32 %v476_v17, %v475_v16 }
 0x12e   : > { %v478_v19 = vrot.slane %v477_v18, 2 }
 0x130   : > { %v479_v20 = vadd.f32 %v478_v19, %v477_v18 }
 0x131   : > { %v491_v21 = vpop.xlane.xlu1 %490 }
 0x132   : > { %v492_v22 = vrot.slane %v491_v21, 4  ;;  %v480_v23 = vrot.slane %v479_v20, 1 }
 0x134   : > { %v493_v24 = vadd.f32 %v492_v22, %v491_v21  ;;  %v481_v25 = vadd.f32 %v480_v23, %v479_v20 }
 0x136   : > { %v494_v26 = vrot.slane %v493_v24, 2  ;;  %662 = vpush %v481_v25 }
 0x138   : > { %v495_v27 = vadd.f32 %v494_v26, %v493_v24 }
 0x13a   : > { %v496_v0 = vrot.slane %v495_v27, 1 }
 0x13c   : > { %v497_v31 = vadd.f32 %v496_v0, %v495_v27 }
 0x13e   : > { %664 = vpush %v497_v31 }
 0x167   : > { %s663_s9 = spop %662 }
 0x16f   : > { %s665_s10 = spop %664 }
 0x170   : > { %s499_s11 = sadd.f32 %s665_s10, %s663_s9 }
 0x172   : > { %s500_s19 = smul.f32 0.001953125, %s499_s11 }
 0x174   : > { %v504_v34 = vstv %s500_s19 }
 0x175   : > { %505 = vst.msk [vmem:[%s287_s14] sm:$0x1] %vm292_vm2, %v504_v34 }
 0x176 PF: > { %s15_s17 = sadd.s32 1, %s713_s17   ;;  %s838_s15 = smov %s709_s16 }
 0x177   : > { %p12_p5 = scmp.ge.s32.totalorder %s15_s17, 4   ;;  %s839_s16 = smov %s841_s18 }
 0x179   :  { %14 = sbr.rel (!%p12_p5) target bundleno = 2 (0x2), region = 88 }

// kernel: text_removal_loss.8
= control target key start
LH: loop header
LB: loop body
LE: loop exit
PB: predicated region body
PF: predicated region fallthrough
CT: control target
= control target key end

     0   :  { %s865_s15 = smov 0   ;;  %s867_s16 = smov 0   ;;  %s1025_s0 = inlined_call_operand.vmem [shape: f32[2,32,16], index: 0, kind: input, shape index: {}]   ;;  %s1026_s1 = inlined_call_operand.vmem [shape: f32[2,32,16], index: 1, kind: input, shape index: {}]   ;;  %s1027_s2 = inlined_call_operand.vmem [shape: f32[2,32,16], index: 2, kind: input, shape index: {}]   ;;  %s1028_s3 = inlined_call_operand.vmem [shape: f32[2,1,1], index: 3, kind: output, shape index: {0}]   ;;  %s1029_s4 = inlined_call_operand.vmem [shape: f32[2,1,1], index: 4, kind: output, shape index: {1}]  }
   0x1   :  { %s869_s17 = smov 0  }
   0x2 LB: > { %s27_s18 = sadd.s32 1, %s833_s16  ;;  %p742_p0 = scmp.ge.s32.totalorder %s837_s17, 1  ;;  %s837_s17 = sphi %s869_s17, %s15_s17   ;;  %s833_s16 = sphi %s867_s16, %s1031_s16   ;;  %s829_s15 = sphi %s865_s15, %s1030_s15  }
   0x3   : > { %p29_p1 = scmp.ge.s32.totalorder %s27_s18, 2  ;;  %p212_p2 = scmp.lt.s32.totalorder %s837_s17, 3 }
   0x5   : > { %s1033_s18 = smov (%p29_p1, %s27_s18), 0  ;;  %p213_p3 = pnand %p742_p0, %p212_p2 }
   0x6   : > { %p258_p4 = scmp.lt.s32.totalorder (!%p213_p3), %s829_s15, 1 }
   0x7   : > { %216 = sbr.rel (%p213_p3) target bundleno = 398 (0x18e), region = 32 }
   0xc   : > { %s1035_s15 = smov (!%p258_p4, %s829_s15), 1  ;;  %vm328_vm0 = vcmask 130048   ;;  %vm294_vm1 = vcmask 261120   ;;  %v839_v11 = vmov 0.0   ;;  %vm292_vm2 = vcmask 0  }
   0xd   : > { %s775_s19 = sshll.u32 %s1035_s15, 5  ;;  %295 = vst.msk [vmem:[#allocation3] sm:$0xff] %vm294_vm1, %v839_v11  ;;  %s284_s8 = scalar_lea.vmem %s1028_s3, %s1035_s15 }
   0xe   : > { %s281_s22 = scalar_lea.vmem %s1027_s2, %s775_s19  ;;  %s265_s25 = scalar_lea.vmem %s1025_s0, %s775_s19  ;;  %296 = vst.msk [vmem:[#allocation3 + $0x8] sm:$0xff] %vm294_vm1, %v839_v11 }
   0xf   : > { %v892_v0 = vld [vmem:[%s281_s22 + $0x18] sm:$0xff]  ;;  %s273_s28 = scalar_lea.vmem %s1026_s1, %s775_s19  ;;  %v905_v3 = vld [vmem:[%s281_s22 + $0x10] sm:$0xff]  ;;  %v316_v6 = vld [vmem:[%s281_s22 + $0x8] sm:$0xff]  ;;  %297 = vst.msk [vmem:[#allocation3 + $0x10] sm:$0xff] %vm294_vm1, %v839_v11  ;;  %s287_s14 = scalar_lea.vmem %s1029_s4, %s1035_s15 }
  0x10   : > { %v894_v1 = vld [vmem:[%s265_s25 + $0x18] sm:$0xff]  ;;  %765 = vmatpush.xpose.msk.msra.mxu2 %vm328_vm0, %v892_v0  ;;  %v309_v4 = vld [vmem:[%s265_s25 + $0x10] sm:$0xff]  ;;  %v308_v7 = vld [vmem:[%s265_s25 + $0x8] sm:$0xff]  ;;  %298 = vst.msk [vmem:[#allocation3 + $0x18] sm:$0xff] %vm294_vm1, %v839_v11 }
  0x11   : > { %749 = vmatpush.xpose.msk.msra.mxu0 %vm328_vm0, %v894_v1  ;;  %v903_v2 = vld [vmem:[%s273_s28 + $0x18] sm:$0xff]  ;;  %778 = vmatpush.xpose.msk.msra.mxu3 %vm328_vm0, %v894_v1  ;;  %v911_v5 = vld [vmem:[%s273_s28 + $0x10] sm:$0xff]  ;;  %v312_v8 = vld [vmem:[%s273_s28 + $0x8] sm:$0xff]  ;;  %299 = vst.msk [vmem:[#allocation4] sm:$0xff] %vm294_vm1, %v839_v11  ;;  %v321_v14 = vsub.f32 %v308_v7, %v316_v6  ;;  %v322_v15 = vsub.f32 %v309_v4, %v905_v3 }
  0x12   : > { %757 = vmatpush.xpose.msk.msra.mxu1 %vm328_vm0, %v903_v2  ;;  %v315_v9 = vld [vmem:[%s281_s22] sm:$0xff]  ;;  %300 = vst.msk [vmem:[#allocation4 + $0x8] sm:$0xff] %vm294_vm1, %v839_v11  ;;  %v346_v18 = vsub.f32 %v312_v8, %v316_v6  ;;  %v323_v20 = vsub.f32 %v894_v1, %v892_v0  ;;  %v347_v25 = vsub.f32 %v911_v5, %v905_v3 }
  0x13   : > { %v307_v10 = vld [vmem:[%s265_s25] sm:$0xff]  ;;  %301 = vst.msk [vmem:[#allocation4 + $0x10] sm:$0xff] %vm294_vm1, %v839_v11  ;;  %v325_v17 = vand.u32 2147483647, %v321_v14  ;;  %v326_v21 = vand.u32 2147483647, %v322_v15  ;;  %v348_v33 = vsub.f32 %v903_v2, %v892_v0 }
  0x14   : > { %766 = vmatpush.xpose.msk.msra.mxu2 %vm328_vm0, %v905_v3  ;;  %v311_v12 = vld [vmem:[%s273_s28] sm:$0xff]  ;;  %302 = vst.msk [vmem:[#allocation4 + $0x18] sm:$0xff] %vm294_vm1, %v839_v11  ;;  %v320_v13 = vsub.f32 %v307_v10, %v315_v9  ;;  %v327_v26 = vand.u32 2147483647, %v323_v20  ;;  %v350_v29 = vand.u32 2147483647, %v346_v18 }
  0x15   : > { %750 = vmatpush.xpose.msk.msra.mxu0 %vm328_vm0, %v309_v4  ;;  %779 = vmatpush.xpose.msk.msra.mxu3 %vm328_vm0, %v309_v4  ;;  %303 = vst.msk [vmem:[#allocation5] sm:$0xff] %vm294_vm1, %v839_v11  ;;  %v345_v19 = vsub.f32 %v311_v12, %v315_v9  ;;  %v330_v23 = vsel %vm328_vm0, %v325_v17, 0.0  ;;  %v332_v27 = vsel %vm328_vm0, %v326_v21, 0.0  ;;  %v351_v34 = vand.u32 2147483647, %v347_v25  ;;  %v374_v40 = vld [vmem:[#allocation3] sm:$0xff] }
  0x16   : > { %758 = vmatpush.xpose.msk.msra.mxu1 %vm328_vm0, %v911_v5  ;;  %304 = vst.msk [vmem:[#allocation5 + $0x8] sm:$0xff] %vm294_vm1, %v839_v11  ;;  %v324_v16 = vand.u32 2147483647, %v320_v13  ;;  %v334_v31 = vsel %vm328_vm0, %v327_v26, 0.0  ;;  %v354_v36 = vsel %vm328_vm0, %v350_v29, 0.0  ;;  %v375_v50 = vld [vmem:[#allocation3 + $0x8] sm:$0xff] }
  0x17   : > { %305 = vst.msk [vmem:[#allocation5 + $0x10] sm:$0xff] %vm294_vm1, %v839_v11  ;;  %v349_v30 = vand.u32 2147483647, %v345_v19  ;;  %v352_v38 = vand.u32 2147483647, %v348_v33  ;;  %v356_v39 = vsel %vm328_vm0, %v351_v34, 0.0 }
  0x18   : > { %767 = vmatpush.xpose.msk.msra.mxu2 %vm328_vm0, %v316_v6  ;;  %306 = vst.msk [vmem:[#allocation5 + $0x18] sm:$0xff] %vm294_vm1, %v839_v11  ;;  %v329_v22 = vsel %vm328_vm0, %v324_v16, 0.0  ;;  %v428_v42 = vld [vmem:[#allocation4] sm:$0xff]  ;;  %v376_v59 = vld [vmem:[#allocation3 + $0x10] sm:$0xff] }
  0x19   : > { %751 = vmatpush.xpose.msk.msra.mxu0 %vm328_vm0, %v308_v7  ;;  %780 = vmatpush.xpose.msk.msra.mxu3 %vm328_vm0, %v308_v7  ;;  %v331_v24 = vadd.f32 %v330_v23, %v329_v22  ;;  %v353_v35 = vsel %vm328_vm0, %v349_v30, 0.0  ;;  %v358_v43 = vsel %vm328_vm0, %v352_v38, 0.0  ;;  %v429_v54 = vld [vmem:[#allocation4 + $0x8] sm:$0xff]  ;;  %293 = vst.msk [vmem:[#allocation2] sm:$0x1] %vm292_vm2, %v839_v11 }
  0x1a   : > { %759 = vmatpush.xpose.msk.msra.mxu1 %vm328_vm0, %v312_v8  ;;  %v355_v37 = vadd.f32 %v354_v36, %v353_v35  ;;  %v430_v63 = vld [vmem:[#allocation4 + $0x10] sm:$0xff] }
  0x1b   : > { %v333_v28 = vadd.f32 %v332_v27, %v331_v24 }
  0x1c   : > { %768 = vmatpush.xpose.msk.msra.mxu2 %vm328_vm0, %v315_v9  ;;  %v357_v41 = vadd.f32 %v356_v39, %v355_v37  ;;  %v481_v49 = vld [vmem:[#allocation5] sm:$0xff] }
  0x1d   : > { %752 = vmatpush.xpose.msk.msra.mxu0 %vm328_vm0, %v307_v10  ;;  %781 = vmatpush.xpose.msk.msra.mxu3 %vm328_vm0, %v307_v10  ;;  %v335_v32 = vadd.f32 %v334_v31, %v333_v28  ;;  %v482_v58 = vld [vmem:[#allocation5 + $0x8] sm:$0xff] }
  0x1e   : > { %760 = vmatpush.xpose.msk.msra.mxu1 %vm328_vm0, %v311_v12  ;;  %v359_v45 = vadd.f32 %v358_v43, %v357_v41 }
  0x1f   : > { %769 = vmatmul.msk.f32.vlgmr.msra.gmra.mxu2 %vm328_vm0, %v315_v9  ;;  %336 = vadd.xlane.f32.xlu0 %v335_v32  ;;  %v484_v15 = vld [vmem:[#allocation5 + $0x18] sm:$0xff] }
  0x20   : > { %753 = vmatmul.msk.f32.vlgmr.msra.gmra.mxu0 %vm328_vm0, %v307_v10  ;;  %754 = vmatmul.msk.f32.vlgmr.msra.gmra.mxu3 %vm328_vm0, %v308_v7 }
  0x21   : > { %761 = vmatmul.msk.f32.vlgmr.msra.gmra.mxu1 %vm328_vm0, %v311_v12 }
  0x27   : > { %770 = vmatmul.msk.f32.gmra.mxu2 %vm328_vm0, %v316_v6  ;;  %360 = vadd.xlane.f32.xlu0 %v359_v45 }
  0x28   : > { %755 = vmatmul.msk.f32.gmra.mxu3 %vm328_vm0, %v309_v4  ;;  %v377_v4 = vld [vmem:[#allocation3 + $0x18] sm:$0xff] }
  0x29   : > { %762 = vmatmul.msk.f32.gmra.mxu1 %vm328_vm0, %v312_v8  ;;  %v431_v8 = vld [vmem:[#allocation4 + $0x18] sm:$0xff] }
  0x2f   : > { %771 = vmatmul.msk.f32.gmra.mxu2 %vm328_vm0, %v905_v3  ;;  %v483_v3 = vld [vmem:[#allocation5 + $0x10] sm:$0xff] }
  0x30   : > { %756 = vmatmul.msk.f32.gmra.mxu3 %vm328_vm0, %v894_v1 }
  0x31   : > { %763 = vmatmul.msk.f32.gmra.mxu1 %vm328_vm0, %v911_v5 }
  0x37   : > { %772 = vmatmul.msk.f32.gmra.mxu2 %vm328_vm0, %v892_v0 }
  0x39   : > { %764 = vmatmul.msk.f32.gmra.mxu1 %vm328_vm0, %v903_v2 }
  0x9d   : > { %v407_v44 = vpop.f32.mrf.mxu0 }
  0x9e   : > { %v419_v46 = vadd.f32 %v407_v44, %v374_v40  ;;  %v461_v47 = vpop.f32.mrf.mxu1 }
  0x9f   : > { %v473_v48 = vadd.f32 %v461_v47, %v428_v42 }
  0xa0   : > { %424 = vst.msk [vmem:[#allocation3] sm:$0xff] %vm294_vm1, %v419_v46 }
  0xa1   : > { %477 = vst.msk [vmem:[#allocation4] sm:$0xff] %vm294_vm1, %v473_v48 }
  0xa2   : > { %v514_v51 = vpop.f32.mrf.mxu2 }
  0xa3   : > { %v526_v52 = vadd.f32 %v514_v51, %v481_v49  ;;  %v410_v53 = vpop.f32.mrf.mxu3 }
  0xa4   : > { %v420_v55 = vadd.f32 %v410_v53, %v375_v50 }
  0xa5   : > { %530 = vst.msk [vmem:[#allocation5] sm:$0xff] %vm294_vm1, %v526_v52 }
  0xa6   : > { %v464_v56 = vpop.f32.mrf.mxu1  ;;  %425 = vst.msk [vmem:[#allocation3 + $0x8] sm:$0xff] %vm294_vm1, %v420_v55 }
  0xa7   : > { %v474_v57 = vadd.f32 %v464_v56, %v429_v54  ;;  %v537_v16 = vld [vmem:[#allocation3] sm:$0xff] }
  0xa8   : > { %v541_v23 = vmul.f32 0.001953125, %v537_v16  ;;  %v545_v32 = vld [vmem:[#allocation4] sm:$0xff] }
  0xa9   : > { %478 = vst.msk [vmem:[#allocation4 + $0x8] sm:$0xff] %vm294_vm1, %v474_v57  ;;  %v549_v38 = vmul.f32 0.001953125, %v545_v32 }
  0xaa   : > { %v517_v60 = vpop.f32.mrf.mxu2 }
  0xab   : > { %v527_v61 = vadd.f32 %v517_v60, %v482_v58  ;;  %v413_v62 = vpop.f32.mrf.mxu3 }
  0xac   : > { %v421_v0 = vadd.f32 %v413_v62, %v376_v59  ;;  %v553_v18 = vld [vmem:[#allocation5] sm:$0xff] }
  0xad   : > { %531 = vst.msk [vmem:[#allocation5 + $0x8] sm:$0xff] %vm294_vm1, %v527_v61  ;;  %v538_v13 = vld [vmem:[#allocation3 + $0x8] sm:$0xff]  ;;  %v557_v25 = vmul.f32 0.001953125, %v553_v18 }
  0xae   : > { %v467_v1 = vpop.f32.mrf.mxu1  ;;  %426 = vst.msk [vmem:[#allocation3 + $0x10] sm:$0xff] %vm294_vm1, %v421_v0  ;;  %v542_v19 = vmul.f32 0.001953125, %v538_v13 }
  0xaf   : > { %v475_v2 = vadd.f32 %v467_v1, %v430_v63  ;;  %v561_v30 = vsub.f32 %v541_v23, %v557_v25  ;;  %v585_v48 = vsub.f32 %v549_v38, %v557_v25 }
  0xb0   : > { %v546_v29 = vld [vmem:[#allocation4 + $0x8] sm:$0xff] }
  0xb1   : > { %479 = vst.msk [vmem:[#allocation4 + $0x10] sm:$0xff] %vm294_vm1, %v475_v2  ;;  %v550_v36 = vmul.f32 0.001953125, %v546_v29  ;;  %v565_v40 = vand.u32 2147483647, %v561_v30  ;;  %v589_v59 = vand.u32 2147483647, %v585_v48 }
  0xb2   : > { %v520_v5 = vpop.f32.mrf.mxu2 }
  0xb3   : > { %v528_v6 = vadd.f32 %v520_v5, %v483_v3  ;;  %v416_v7 = vpop.f32.mrf.mxu3  ;;  %v569_v50 = vsel %vm294_vm1, %v565_v40, 0.0  ;;  %v593_v0 = vsel %vm294_vm1, %v589_v59, 0.0 }
  0xb4   : > { %v422_v9 = vadd.f32 %v416_v7, %v377_v4  ;;  %v554_v14 = vld [vmem:[#allocation5 + $0x8] sm:$0xff] }
  0xb5   : > { %532 = vst.msk [vmem:[#allocation5 + $0x10] sm:$0xff] %vm294_vm1, %v528_v6  ;;  %v539_v17 = vld [vmem:[#allocation3 + $0x10] sm:$0xff]  ;;  %v558_v20 = vmul.f32 0.001953125, %v554_v14  ;;  %v337_v6 = vpop.xlane.xlu0 %336 }
  0xb6   : > { %v470_v10 = vpop.f32.mrf.mxu1  ;;  %427 = vst.msk [vmem:[#allocation3 + $0x18] sm:$0xff] %vm294_vm1, %v422_v9  ;;  %v543_v24 = vmul.f32 0.001953125, %v539_v17  ;;  %v338_v7 = vrot.slane %v337_v6, 4 }
  0xb7   : > { %v476_v12 = vadd.f32 %v470_v10, %v431_v8  ;;  %v562_v28 = vsub.f32 %v542_v19, %v558_v20  ;;  %v586_v47 = vsub.f32 %v550_v36, %v558_v20 }
  0xb8   : > { %v547_v34 = vld [vmem:[#allocation4 + $0x10] sm:$0xff]  ;;  %v339_v8 = vadd.f32 %v338_v7, %v337_v6 }
  0xb9   : > { %480 = vst.msk [vmem:[#allocation4 + $0x18] sm:$0xff] %vm294_vm1, %v476_v12  ;;  %v566_v35 = vand.u32 2147483647, %v562_v28  ;;  %v551_v42 = vmul.f32 0.001953125, %v547_v34  ;;  %v590_v56 = vand.u32 2147483647, %v586_v47 }
  0xba   : > { %v523_v21 = vpop.f32.mrf.mxu2  ;;  %v340_v9 = vrot.slane %v339_v8, 2 }
  0xbb   : > { %v529_v22 = vadd.f32 %v523_v21, %v484_v15  ;;  %v570_v45 = vsel %vm294_vm1, %v566_v35, 0.0  ;;  %v594_v63 = vsel %vm294_vm1, %v590_v56, 0.0 }
  0xbc   : > { %v555_v26 = vld [vmem:[#allocation5 + $0x10] sm:$0xff]  ;;  %v571_v53 = vadd.f32 %v570_v45, %v569_v50  ;;  %v595_v2 = vadd.f32 %v594_v63, %v593_v0  ;;  %v341_v10 = vadd.f32 %v340_v9, %v339_v8 }
  0xbd   : > { %533 = vst.msk [vmem:[#allocation5 + $0x18] sm:$0xff] %vm294_vm1, %v529_v22  ;;  %v559_v27 = vmul.f32 0.001953125, %v555_v26  ;;  %v540_v33 = vld [vmem:[#allocation3 + $0x18] sm:$0xff]  ;;  %v361_v12 = vpop.xlane.xlu0 %360 }
  0xbe   : > { %v544_v39 = vmul.f32 0.001953125, %v540_v33  ;;  %v362_v13 = vrot.slane %v361_v12, 4  ;;  %v342_v14 = vrot.slane %v341_v10, 1  ;;  %v319_v33 = vld [vmem:[#allocation2] sm:$0x1] }
  0xbf   : > { %v563_v31 = vsub.f32 %v543_v24, %v559_v27  ;;  %v587_v52 = vsub.f32 %v551_v42, %v559_v27 }
  0xc0   : > { %v548_v37 = vld [vmem:[#allocation4 + $0x18] sm:$0xff]  ;;  %v363_v15 = vadd.f32 %v362_v13, %v361_v12  ;;  %v343_v16 = vadd.f32 %v342_v14, %v341_v10 }
  0xc1   : > { %v567_v41 = vand.u32 2147483647, %v563_v31  ;;  %v552_v46 = vmul.f32 0.001953125, %v548_v37  ;;  %v591_v60 = vand.u32 2147483647, %v587_v52 }
  0xc2   : > { %v364_v17 = vrot.slane %v363_v15, 2  ;;  %782 = vpush %v343_v16 }
  0xc3   : > { %v572_v51 = vsel %vm294_vm1, %v567_v41, 0.0  ;;  %v596_v1 = vsel %vm294_vm1, %v591_v60, 0.0 }
  0xc4   : > { %v556_v43 = vld [vmem:[#allocation5 + $0x18] sm:$0xff]  ;;  %v573_v57 = vadd.f32 %v572_v51, %v571_v53  ;;  %v597_v4 = vadd.f32 %v596_v1, %v595_v2  ;;  %v365_v18 = vadd.f32 %v364_v17, %v363_v15 }
  0xc5   : > { %v560_v44 = vmul.f32 0.001953125, %v556_v43 }
  0xc6   : > { %v366_v19 = vrot.slane %v365_v18, 1 }
  0xc7   : > { %v564_v49 = vsub.f32 %v544_v39, %v560_v44  ;;  %v588_v55 = vsub.f32 %v552_v46, %v560_v44 }
  0xc8   : > { %v367_v20 = vadd.f32 %v366_v19, %v365_v18 }
  0xc9   : > { %v568_v54 = vand.u32 2147483647, %v564_v49  ;;  %v592_v62 = vand.u32 2147483647, %v588_v55 }
  0xca   : > { %784 = vpush %v367_v20 }
  0xcb   : > { %v574_v58 = vsel %vm294_vm1, %v568_v54, 0.0  ;;  %v598_v3 = vsel %vm294_vm1, %v592_v62, 0.0 }
  0xcc   : > { %v575_v61 = vadd.f32 %v574_v58, %v573_v57  ;;  %v599_v5 = vadd.f32 %v598_v3, %v597_v4 }
  0xce   : > { %576 = vadd.xlane.f32.xlu1 %v575_v61 }
  0xd6   : > { %600 = vadd.xlane.f32.xlu1 %v599_v5 }
  0xf3   : > { %s783_s29 = spop %782 }
  0xfb   : > { %s785_s30 = spop %784 }
  0xfc   : > { %s369_s5 = sadd.f32 %s785_s30, %s783_s29 }
  0xfe   : > { %v370_v34 = vstv %s369_s5 }
  0xff   : > { %v371_v35 = vadd.f32 %v370_v34, %v319_v33 }
 0x101   : > { %373 = vst.msk [vmem:[#allocation2] sm:$0x1] %vm292_vm2, %v371_v35 }
 0x108   : > { %v611_v37 = vld [vmem:[#allocation2] sm:$0x1] }
 0x109   : > { %v612_v38 = vmul.f32 0.0009765625, %v611_v37 }
 0x10b   : > { %613 = vst.msk [vmem:[%s284_s8] sm:$0x1] %vm292_vm2, %v612_v38 }
 0x141   : > { %v577_v21 = vpop.xlane.xlu1 %576 }
 0x142   : > { %v578_v22 = vrot.slane %v577_v21, 4 }
 0x144   : > { %v579_v23 = vadd.f32 %v578_v22, %v577_v21 }
 0x146   : > { %v580_v24 = vrot.slane %v579_v23, 2 }
 0x148   : > { %v581_v25 = vadd.f32 %v580_v24, %v579_v23 }
 0x149   : > { %v601_v26 = vpop.xlane.xlu1 %600 }
 0x14a   : > { %v602_v27 = vrot.slane %v601_v26, 4  ;;  %v582_v28 = vrot.slane %v581_v25, 1 }
 0x14c   : > { %v603_v29 = vadd.f32 %v602_v27, %v601_v26  ;;  %v583_v30 = vadd.f32 %v582_v28, %v581_v25 }
 0x14e   : > { %v604_v31 = vrot.slane %v603_v29, 2  ;;  %786 = vpush %v583_v30 }
 0x150   : > { %v605_v32 = vadd.f32 %v604_v31, %v603_v29 }
 0x152   : > { %v606_v11 = vrot.slane %v605_v32, 1 }
 0x154   : > { %v607_v36 = vadd.f32 %v606_v11, %v605_v32 }
 0x156   : > { %788 = vpush %v607_v36 }
 0x17f   : > { %s787_s9 = spop %786 }
 0x187   : > { %s789_s10 = spop %788 }
 0x188   : > { %s609_s11 = sadd.f32 %s789_s10, %s787_s9 }
 0x18a   : > { %s610_s19 = smul.f32 0.00048828125, %s609_s11 }
 0x18c   : > { %v614_v39 = vstv %s610_s19 }
 0x18d   : > { %615 = vst.msk [vmem:[%s287_s14] sm:$0x1] %vm292_vm2, %v614_v39 }
 0x18e PF: > { %s15_s17 = sadd.s32 1, %s837_s17   ;;  %s1030_s15 = smov %s833_s16 }
 0x18f   : > { %p12_p5 = scmp.ge.s32.totalorder %s15_s17, 4   ;;  %s1031_s16 = smov %s1033_s18 }
 0x191   :  { %14 = sbr.rel (!%p12_p5) target bundleno = 2 (0x2), region = 88 }

</bundles_post_ra>
